<compile_context>
chip_gen: v7x
topology: tpu7x:2x2x1
jax: 0.10.0
libtpu: 0.0.40
codegen_flags: <defaults>
</compile_context>

<pallas_src>
import jax
import jax.numpy as jnp
from jax.experimental import pallas as pl
from jax.experimental.pallas import tpu as pltpu

# Conv2d args per downsample rate: [kernel, stride, padding, dilation]
CONVS_SETTING = {1: [3, 1, 1, 1], 2: [3, 2, 1, 1], 4: [3, 4, 1, 2],
                 8: [5, 8, 1, 2], 16: [7, 16, 3, 3]}
BN_EPS = 1e-5
LANE = 128
SUBLANE = 8


def _round_up(v, m):
    return ((v + m - 1) // m) * m


# ------------------------------ JAX glue ----------------------------------- #

def _im2col_nhwc(x, k, stride, pad, dil):
    """x: (N, H, W, C) -> (N, Ho*Wo, k*k*C), column order = (kh, kw, cin)."""
    N, H, W, C = x.shape
    Ho = (H + 2 * pad - dil * (k - 1) - 1) // stride + 1
    Wo = (W + 2 * pad - dil * (k - 1) - 1) // stride + 1
    xp = jnp.pad(x, ((0, 0), (pad, pad), (pad, pad), (0, 0)))
    cols = []
    for kh in range(k):
        for kw in range(k):
            h0, w0 = kh * dil, kw * dil
            cols.append(xp[:, h0:h0 + stride * (Ho - 1) + 1:stride,
                            w0:w0 + stride * (Wo - 1) + 1:stride, :])
    patches = jnp.concatenate(cols, axis=-1)               # (N, Ho, Wo, k*k*C)
    return patches.reshape(N, Ho * Wo, k * k * C), Ho, Wo


def spatial_attn_forward(x_nchw, params, downsample_rate):
    k, s, p, d = CONVS_SETTING[downsample_rate]
    r = downsample_rate
    x = jnp.transpose(x_nchw, (0, 2, 3, 1)).astype(jnp.float32)   # NHWC
    N, H, W, C = x.shape
    C2 = 2 * C
    Cp = _round_up(C, LANE)            # padded pool-channel count (lane dense out)
    C2p = _round_up(C2, LANE)          # packed-y / attn hidden channel count

    # ---- pooling windows at TRUE channel count (no zero lanes in HBM) -------
    Hp, Wp = H // r, W // r
    wins = [x[:, pi:pi + r * Hp:r, pj:pj + r * Wp:r, :].reshape(N, Hp * Wp, C)
            for pi in range(r) for pj in range(r)]
    pw = jnp.stack(wins, axis=1)                           # (N, r*r, M_img, C) f32

    # ---- im2col patches for the downsampling conv (bf16 MXU operands) -------
    patches, Ho, Wo = _im2col_nhwc(x, k, s, p, d)          # (N, Ho*Wo, k*k*C)
    assert (Ho, Wo) == (Hp, Wp), "pool grid and conv grid must agree"
    M_img = Ho * Wo
    KC = k * k * C
    patches = patches.astype(jnp.bfloat16)
    # TODO(synk): the im2col path still carries a k^2/s^2 HBM read blow-up; a
    # shifted-accumulate formulation (like the attn conv) would remove it for
    # rate 1/2 and shrink it for rate 8/16.

    # ---- parameters, padded / folded once in the wrapper --------------------
    # W1 output columns land directly in packed-y columns [C:2C].
    w1 = jnp.transpose(params["W1"], (2, 3, 1, 0)).reshape(KC, C)
    w1_pad = (jnp.zeros((KC, C2p), jnp.float32)
              .at[:, C:C2].set(w1).astype(jnp.bfloat16))
    b1_pad = jnp.zeros((1, C2p), jnp.float32).at[:, C:C2].set(
        params["b1"].reshape(1, C))

    # attn 3x3 weights, one (in, out) matrix per tap; packed-y rows [0:C]=pool,
    # [C:2C]=conv match PyTorch's cat([pool, conv]) channel order exactly.
    wa1 = jnp.transpose(params["Wa1"], (2, 3, 1, 0)).reshape(9, C2, C2)
    wa1_pad = (jnp.zeros((9, C2p, C2p), jnp.float32)
               .at[:, :C2, :C2].set(wa1).astype(jnp.bfloat16))

    # eval-mode BatchNorm folded to scale/shift; conv bias ba1 folded in too.
    scale = params["gamma"] * jax.lax.rsqrt(params["var"] + BN_EPS)
    shift = (params["ba1"] - params["mean"]) * scale + params["beta"]
    scale_pad = jnp.zeros((1, C2p), jnp.float32).at[:, :C2].set(scale.reshape(1, C2))
    shift_pad = jnp.zeros((1, C2p), jnp.float32).at[:, :C2].set(shift.reshape(1, C2))

    # 1x1 conv weight replicated across Cp output lanes -> lane-dense logit.
    wa2 = params["Wa2"].reshape(C2)
    wa2_rep = (jnp.zeros((C2p, Cp), jnp.float32)
               .at[:C2, :].set(jnp.broadcast_to(wa2[:, None], (C2, Cp)))
               .astype(jnp.bfloat16))
    ba2_row = jnp.broadcast_to(params["ba2"].reshape(1, 1), (1, Cp)).astype(jnp.float32)

    # left/right validity masks for the W-direction taps of the 3x3 conv
    jj = jnp.arange(M_img, dtype=jnp.int32) % Wo
    masks = jnp.stack([(jj > 0), (jj < Wo - 1)], axis=1).astype(jnp.float32)

    r2 = r * r
    P = _round_up(Wo + 1, SUBLANE)      # top/bottom zero-row halo (sublane aligned)
    YROWS = M_img + 2 * P

    # ------------------------------ fused kernel --------------------------- #
    def kernel(pw_ref, p1_ref, masks_ref, w1_ref, b1_ref, wa1_ref,
               scale_ref, shift_ref, wa2_ref, ba2_ref, out_ref, ypad_ref):
        # MaxPool2d(r, r): pairwise tree max over the r*r planes (f32 exact),
        # log-depth dependency chain and bounded live ranges for r=8/16.
        planes = [pw_ref[t] for t in range(r2)]
        while len(planes) > 1:
            nxt = [jnp.maximum(planes[i], planes[i + 1])
                   for i in range(0, len(planes) - 1, 2)]
            if len(planes) % 2:
                nxt.append(planes[-1])
            planes = nxt
        pool = planes[0]                                    # (M_img, C) f32

        # downsampling conv = one bf16 im2col matmul, f32 accumulate.  Weight
        # layout already places the result at packed-y cols [C:2C], 0 elsewhere.
        conv_slab = jnp.dot(p1_ref[...], w1_ref[...],
                            preferred_element_type=jnp.float32) + b1_ref[...]

        # Zero only the 2*P halo rows (cheap; done every step so it is safe
        # under megacore per-core scratch).  Interior rows are fully rewritten.
        ypad_ref[0:P, :] = jnp.zeros((P, C2p), jnp.float32)
        ypad_ref[P + M_img:P + M_img + P, :] = jnp.zeros((P, C2p), jnp.float32)
        # packed y = [pool | conv | 0...] in one C2p-wide lane block.
        ypad_ref[P:P + M_img, :] = conv_slab
        ypad_ref[P:P + M_img, 0:C] = pool

        # attn 3x3 conv = 9 shifted-accumulate bf16 matmuls over VMEM-resident
        # packed y.  H boundary via zero halo rows; W boundary via only 2 mask
        # multiplies because taps are grouped by their W-shift (dw).
        mask_l = masks_ref[:, 0:1]
        mask_r = masks_ref[:, 1:2]
        acc = None
        for dw, mask in ((-1, mask_l), (0, None), (1, mask_r)):
            grp = None
            for dh in (-1, 0, 1):
                t = (dh + 1) * 3 + (dw + 1)
                start = P + dh * Wo + dw
                ys = ypad_ref[start:start + M_img, :].astype(jnp.bfloat16)
                contrib = jnp.dot(ys, wa1_ref[t],
                                  preferred_element_type=jnp.float32)
                grp = contrib if grp is None else grp + contrib
            if mask is not None:
                grp = grp * mask
            acc = grp if acc is None else acc + grp

        # folded BatchNorm (eval) + ReLU
        h = jnp.maximum(acc * scale_ref[...] + shift_ref[...], 0.0)

        # 1x1 conv on the MXU (bf16, replicated weight -> (M, Cp) logit);
        # sigmoid on the EUP: exp + approximate reciprocal (no VPU divide).
        logit = jnp.dot(h.astype(jnp.bfloat16), wa2_ref[...],
                        preferred_element_type=jnp.float32) + ba2_ref[...]
        attn = pl.reciprocal(1.0 + jnp.exp(-logit), approx=True)

        # gate: packed-y columns [0:C] are the pooled features; output columns
        # [C:Cp] are dead lanes the wrapper slices away (lane-dense store).
        out_ref[...] = ypad_ref[P:P + M_img, 0:Cp] * attn

    # TODO(synk): for large Ho*Wo additionally tile the grid over Ho row
    # strips with a 1-row recomputed halo so per-step VMEM stays bounded
    # (needed for v7x's 64 MiB VMEM / v5e's small scoped limit on big maps).

    idx_n3 = lambda n: (n, 0, 0)
    const2 = lambda n: (0, 0)
    const3 = lambda n: (0, 0, 0)

    # explicit VMEM budget from the actual per-step footprint (+ headroom),
    # clamped so the cap stays legal on every chip generation (<= 56 MiB).
    def _lp(c): return _round_up(max(c, 1), LANE)
    def _sp(rr): return _round_up(max(rr, 1), SUBLANE)
    est = 0
    est += 2 * r2 * _sp(M_img) * _lp(C) * 4            # pool windows (2 bufs)
    est += 2 * _sp(M_img) * _lp(KC) * 2                # im2col patches (bf16)
    est += 2 * _sp(M_img) * _lp(2) * 4                 # masks
    est += 2 * _sp(KC) * _lp(C2p) * 2                  # W1 (bf16)
    est += 2 * _sp(1) * _lp(C2p) * 4                   # b1
    est += 2 * 9 * _sp(C2p) * _lp(C2p) * 2             # Wa1 taps (bf16)
    est += 4 * _sp(1) * _lp(C2p) * 4                   # BN scale/shift
    est += 2 * _sp(C2p) * _lp(Cp) * 2                  # Wa2 (bf16)
    est += 2 * _sp(1) * _lp(Cp) * 4                    # ba2
    est += 2 * _sp(M_img) * _lp(Cp) * 4                # output
    est += _sp(YROWS) * _lp(C2p) * 4                   # ypad scratch
    vmem_limit = int(min(max(est + (4 << 20), 16 << 20), 56 << 20))

    flops = N * (2 * M_img * KC * C2p
                 + 9 * 2 * M_img * C2p * C2p
                 + 2 * M_img * C2p * Cp)
    transc = N * M_img * Cp
    bytes_acc = (pw.size * 4 + patches.size * 2 + masks.size * 4
                 + w1_pad.size * 2 + b1_pad.size * 4 + wa1_pad.size * 2
                 + scale_pad.size * 4 + shift_pad.size * 4
                 + wa2_rep.size * 2 + ba2_row.size * 4
                 + N * M_img * Cp * 4)

    out_padded = pl.pallas_call(
        kernel,
        grid=(N,),
        in_specs=[
            pl.BlockSpec((None, r2, M_img, C), lambda n: (n, 0, 0, 0)),  # pool windows (true C)
            pl.BlockSpec((None, M_img, KC), idx_n3),                     # conv patches (bf16)
            pl.BlockSpec((M_img, 2), const2),                            # W-boundary masks
            pl.BlockSpec((KC, C2p), const2),                             # W1 (bf16)
            pl.BlockSpec((1, C2p), const2),                              # b1
            pl.BlockSpec((9, C2p, C2p), const3),                         # Wa1 taps (bf16)
            pl.BlockSpec((1, C2p), const2),                              # BN scale
            pl.BlockSpec((1, C2p), const2),                              # BN shift (+ba1)
            pl.BlockSpec((C2p, Cp), const2),                             # Wa2 replicated (bf16)
            pl.BlockSpec((1, Cp), const2),                               # ba2 replicated
        ],
        out_specs=pl.BlockSpec((None, M_img, Cp), idx_n3),
        out_shape=jax.ShapeDtypeStruct((N, M_img, Cp), jnp.float32),
        scratch_shapes=[pltpu.VMEM((YROWS, C2p), jnp.float32)],
        compiler_params=pltpu.CompilerParams(
            dimension_semantics=("parallel",),
            vmem_limit_bytes=vmem_limit),
        cost_estimate=pl.CostEstimate(
            flops=flops, transcendentals=transc, bytes_accessed=bytes_acc),
    )(pw, patches, masks, w1_pad, b1_pad, wa1_pad,
      scale_pad, shift_pad, wa2_rep, ba2_row)

    out = out_padded[:, :, :C].reshape(N, Ho, Wo, C)
    return jnp.transpose(out, (0, 3, 1, 2))                              # NCHW


# -------------------------- pure-JAX reference ------------------------------ #

def ref_forward(x, params, r):
    k, s, p, d = CONVS_SETTING[r]
    dn = ("NCHW", "OIHW", "NCHW")
    pool = jax.lax.reduce_window(x, -jnp.inf, jax.lax.max,
                                 (1, 1, r, r), (1, 1, r, r), "VALID")
    conv = jax.lax.conv_general_dilated(
        x, params["W1"], (s, s), ((p, p), (p, p)),
        rhs_dilation=(d, d), dimension_numbers=dn)
    conv = conv + params["b1"][None, :, None, None]
    y = jnp.concatenate([pool, conv], axis=1)
    h = jax.lax.conv_general_dilated(
        y, params["Wa1"], (1, 1), ((1, 1), (1, 1)), dimension_numbers=dn)
    h = h + params["ba1"][None, :, None, None]
    inv_std = jax.lax.rsqrt(params["var"] + BN_EPS)[None, :, None, None]
    h = (h - params["mean"][None, :, None, None]) * inv_std
    h = h * params["gamma"][None, :, None, None] + params["beta"][None, :, None, None]
    h = jnp.maximum(h, 0.0)
    a = jax.lax.conv_general_dilated(
        h, params["Wa2"], (1, 1), ((0, 0), (0, 0)), dimension_numbers=dn)
    a = a + params["ba2"][None, :, None, None]
    a = 1.0 / (1.0 + jnp.exp(-a))
    return pool * a


# --------------------------------- main ------------------------------------ #

if __name__ == "__main__":
    N, C, H, W = 2, 4, 16, 16
    r = 2                       # downsample_rate
    C2 = 2 * C
    k, s, p, d = CONVS_SETTING[r]

    key = jax.random.PRNGKey(0)
    ks = jax.random.split(key, 11)
    params = {
        "W1":  0.1 * jax.random.normal(ks[0], (C, C, k, k), jnp.float32),
        "b1":  0.1 * jax.random.normal(ks[1], (C,), jnp.float32),
        "Wa1": 0.1 * jax.random.normal(ks[2], (C2, C2, 3, 3), jnp.float32),
        "ba1": 0.1 * jax.random.normal(ks[3], (C2,), jnp.float32),
        "gamma": 1.0 + 0.1 * jax.random.normal(ks[4], (C2,), jnp.float32),
        "beta":  0.1 * jax.random.normal(ks[5], (C2,), jnp.float32),
        "mean":  0.1 * jax.random.normal(ks[6], (C2,), jnp.float32),
        "var":   1.0 + 0.1 * jnp.abs(jax.random.normal(ks[7], (C2,), jnp.float32)),
        "Wa2": 0.1 * jax.random.normal(ks[8], (1, C2, 1, 1), jnp.float32),
        "ba2": 0.1 * jax.random.normal(ks[9], (1,), jnp.float32),
    }
    x = jax.random.normal(ks[10], (N, C, H, W), jnp.float32)

    out = spatial_attn_forward(x, params, r)
    out = jax.block_until_ready(out)

    ref = ref_forward(x, params, r)
    assert out.shape == ref.shape == (N, C, H // r, W // r)
    # bf16 MXU operands + EUP approximate reciprocal -> slightly looser tol
    assert bool(jnp.allclose(out, ref, atol=2e-2, rtol=2e-2)), "mismatch vs reference"

    print("KERNEL_OK")
</pallas_src>

<mosaic_0001>
module attributes {stable_mosaic.version = 11 : i64} {
  func.func @kernel(%arg0: i32, %arg1: memref<1x4x64x4xf32, #tpu.memory_space<vmem>>, %arg2: memref<1x64x36xbf16, #tpu.memory_space<vmem>>, %arg3: memref<64x2xf32, #tpu.memory_space<vmem>>, %arg4: memref<36x128xbf16, #tpu.memory_space<vmem>>, %arg5: memref<1x128xf32, #tpu.memory_space<vmem>>, %arg6: memref<9x128x128xbf16, #tpu.memory_space<vmem>>, %arg7: memref<1x128xf32, #tpu.memory_space<vmem>>, %arg8: memref<1x128xf32, #tpu.memory_space<vmem>>, %arg9: memref<128x128xbf16, #tpu.memory_space<vmem>>, %arg10: memref<1x128xf32, #tpu.memory_space<vmem>>, %arg11: memref<1x64x128xf32, #tpu.memory_space<vmem>>, %arg12: memref<96x128xf32, #tpu.memory_space<vmem>>) attributes {dimension_semantics = [#tpu.dimension_semantics<parallel>], iteration_bounds = array<i64: 2>, scalar_prefetch = 0 : i64, scratch_operands = 1 : i64, tpu.core_type = #tpu.core_type<tc>, window_params = [{transform_indices = @transform_0, window_bounds = array<i64: 1, 4, 64, 4>}, {transform_indices = @transform_1, window_bounds = array<i64: 1, 64, 36>}, {pipeline_mode = #tpu.pipeline_mode<synchronous>, transform_indices = @transform_2, window_bounds = array<i64: 64, 2>}, {pipeline_mode = #tpu.pipeline_mode<synchronous>, transform_indices = @transform_3, window_bounds = array<i64: 36, 128>}, {pipeline_mode = #tpu.pipeline_mode<synchronous>, transform_indices = @transform_4, window_bounds = array<i64: 1, 128>}, {pipeline_mode = #tpu.pipeline_mode<synchronous>, transform_indices = @transform_5, window_bounds = array<i64: 9, 128, 128>}, {pipeline_mode = #tpu.pipeline_mode<synchronous>, transform_indices = @transform_6, window_bounds = array<i64: 1, 128>}, {pipeline_mode = #tpu.pipeline_mode<synchronous>, transform_indices = @transform_7, window_bounds = array<i64: 1, 128>}, {pipeline_mode = #tpu.pipeline_mode<synchronous>, transform_indices = @transform_8, window_bounds = array<i64: 128, 128>}, {pipeline_mode = #tpu.pipeline_mode<synchronous>, transform_indices = @transform_9, window_bounds = array<i64: 1, 128>}, {transform_indices = @transform_10, window_bounds = array<i64: 1, 64, 128>}]} {
    %c0 = arith.constant 0 : index
    %c0_0 = arith.constant 0 : index
    %c0_1 = arith.constant 0 : index
    %c0_2 = arith.constant 0 : index
    %0 = vector.load %arg1[%c0, %c0_0, %c0_1, %c0_2] : memref<1x4x64x4xf32, #tpu.memory_space<vmem>>, vector<1x1x64x4xf32>
    %1 = vector.shape_cast %0 : vector<1x1x64x4xf32> to vector<64x4xf32>
    %c0_3 = arith.constant 0 : index
    %c1 = arith.constant 1 : index
    %c0_4 = arith.constant 0 : index
    %c0_5 = arith.constant 0 : index
    %2 = vector.load %arg1[%c0_3, %c1, %c0_4, %c0_5] : memref<1x4x64x4xf32, #tpu.memory_space<vmem>>, vector<1x1x64x4xf32>
    %3 = vector.shape_cast %2 : vector<1x1x64x4xf32> to vector<64x4xf32>
    %c0_6 = arith.constant 0 : index
    %c2 = arith.constant 2 : index
    %c0_7 = arith.constant 0 : index
    %c0_8 = arith.constant 0 : index
    %4 = vector.load %arg1[%c0_6, %c2, %c0_7, %c0_8] : memref<1x4x64x4xf32, #tpu.memory_space<vmem>>, vector<1x1x64x4xf32>
    %5 = vector.shape_cast %4 : vector<1x1x64x4xf32> to vector<64x4xf32>
    %c0_9 = arith.constant 0 : index
    %c3 = arith.constant 3 : index
    %c0_10 = arith.constant 0 : index
    %c0_11 = arith.constant 0 : index
    %6 = vector.load %arg1[%c0_9, %c3, %c0_10, %c0_11] : memref<1x4x64x4xf32, #tpu.memory_space<vmem>>, vector<1x1x64x4xf32>
    %7 = vector.shape_cast %6 : vector<1x1x64x4xf32> to vector<64x4xf32>
    %8 = arith.maximumf %1, %3 : vector<64x4xf32>
    %9 = arith.maximumf %5, %7 : vector<64x4xf32>
    %10 = arith.maximumf %8, %9 : vector<64x4xf32>
    %c0_12 = arith.constant 0 : index
    %c0_13 = arith.constant 0 : index
    %c0_14 = arith.constant 0 : index
    %11 = vector.load %arg2[%c0_12, %c0_13, %c0_14] : memref<1x64x36xbf16, #tpu.memory_space<vmem>>, vector<1x64x36xbf16>
    %12 = vector.shape_cast %11 : vector<1x64x36xbf16> to vector<64x36xbf16>
    %c0_15 = arith.constant 0 : index
    %c0_16 = arith.constant 0 : index
    %13 = vector.load %arg4[%c0_15, %c0_16] : memref<36x128xbf16, #tpu.memory_space<vmem>>, vector<36x128xbf16>
    %cst = arith.constant dense<0.000000e+00> : vector<64x128xf32>
    %14 = tpu.matmul %12, %13, %cst {dimension_numbers = #tpu.dot_dimension_numbers<[1], [0], [0], [1], [0, 0, 1, 1], [], []>} : vector<64x36xbf16>, vector<36x128xbf16>, vector<64x128xf32> -> vector<64x128xf32>
    %c0_17 = arith.constant 0 : index
    %c0_18 = arith.constant 0 : index
    %15 = vector.load %arg5[%c0_17, %c0_18] : memref<1x128xf32, #tpu.memory_space<vmem>>, vector<1x128xf32>
    %16 = vector.broadcast %15 : vector<1x128xf32> to vector<64x128xf32>
    %17 = arith.addf %14, %16 : vector<64x128xf32>
    %cst_19 = arith.constant 0.000000e+00 : f32
    %18 = vector.broadcast %cst_19 : f32 to vector<16x128xf32>
    %c0_20 = arith.constant 0 : index
    %c0_21 = arith.constant 0 : index
    %19 = vector.load %arg12[%c0_20, %c0_21] : memref<96x128xf32, #tpu.memory_space<vmem>>, vector<16x128xf32>
    tpu.vector_store %arg12[%c0_20, %c0_21], %18 {strides = array<i32>} : memref<96x128xf32, #tpu.memory_space<vmem>>, vector<16x128xf32>,
    %cst_22 = arith.constant 0.000000e+00 : f32
    %20 = vector.broadcast %cst_22 : f32 to vector<16x128xf32>
    %c80 = arith.constant 80 : index
    %c0_23 = arith.constant 0 : index
    %21 = vector.load %arg12[%c80, %c0_23] : memref<96x128xf32, #tpu.memory_space<vmem>>, vector<16x128xf32>
    tpu.vector_store %arg12[%c80, %c0_23], %20 {strides = array<i32>} : memref<96x128xf32, #tpu.memory_space<vmem>>, vector<16x128xf32>,
    %c16 = arith.constant 16 : index
    %c0_24 = arith.constant 0 : index
    %22 = vector.load %arg12[%c16, %c0_24] : memref<96x128xf32, #tpu.memory_space<vmem>>, vector<64x128xf32>
    tpu.vector_store %arg12[%c16, %c0_24], %17 {strides = array<i32>} : memref<96x128xf32, #tpu.memory_space<vmem>>, vector<64x128xf32>,
    %c16_25 = arith.constant 16 : index
    %c0_26 = arith.constant 0 : index
    %23 = vector.load %arg12[%c16_25, %c0_26] : memref<96x128xf32, #tpu.memory_space<vmem>>, vector<64x4xf32>
    tpu.vector_store %arg12[%c16_25, %c0_26], %10 {strides = array<i32>} : memref<96x128xf32, #tpu.memory_space<vmem>>, vector<64x4xf32>,
    %c0_27 = arith.constant 0 : index
    %c0_28 = arith.constant 0 : index
    %24 = vector.load %arg3[%c0_27, %c0_28] : memref<64x2xf32, #tpu.memory_space<vmem>>, vector<64x1xf32>
    %c0_29 = arith.constant 0 : index
    %c1_30 = arith.constant 1 : index
    %25 = vector.load %arg3[%c0_29, %c1_30] : memref<64x2xf32, #tpu.memory_space<vmem>>, vector<64x1xf32>
    %c7 = arith.constant 7 : index
    %c0_31 = arith.constant 0 : index
    %26 = vector.load %arg12[%c7, %c0_31] : memref<96x128xf32, #tpu.memory_space<vmem>>, vector<64x128xf32>
    %27 = arith.truncf %26 : vector<64x128xf32> to vector<64x128xbf16>
    %c0_32 = arith.constant 0 : index
    %c0_33 = arith.constant 0 : index
    %c0_34 = arith.constant 0 : index
    %28 = vector.load %arg6[%c0_32, %c0_33, %c0_34] : memref<9x128x128xbf16, #tpu.memory_space<vmem>>, vector<1x128x128xbf16>
    %29 = vector.shape_cast %28 : vector<1x128x128xbf16> to vector<128x128xbf16>
    %cst_35 = arith.constant dense<0.000000e+00> : vector<64x128xf32>
    %30 = tpu.matmul %27, %29, %cst_35 {dimension_numbers = #tpu.dot_dimension_numbers<[1], [0], [0], [1], [0, 0, 1, 1], [], []>} : vector<64x128xbf16>, vector<128x128xbf16>, vector<64x128xf32> -> vector<64x128xf32>
    %c15 = arith.constant 15 : index
    %c0_36 = arith.constant 0 : index
    %31 = vector.load %arg12[%c15, %c0_36] : memref<96x128xf32, #tpu.memory_space<vmem>>, vector<64x128xf32>
    %32 = arith.truncf %31 : vector<64x128xf32> to vector<64x128xbf16>
    %c3_37 = arith.constant 3 : index
    %c0_38 = arith.constant 0 : index
    %c0_39 = arith.constant 0 : index
    %33 = vector.load %arg6[%c3_37, %c0_38, %c0_39] : memref<9x128x128xbf16, #tpu.memory_space<vmem>>, vector<1x128x128xbf16>
    %34 = vector.shape_cast %33 : vector<1x128x128xbf16> to vector<128x128xbf16>
    %cst_40 = arith.constant dense<0.000000e+00> : vector<64x128xf32>
    %35 = tpu.matmul %32, %34, %cst_40 {dimension_numbers = #tpu.dot_dimension_numbers<[1], [0], [0], [1], [0, 0, 1, 1], [], []>} : vector<64x128xbf16>, vector<128x128xbf16>, vector<64x128xf32> -> vector<64x128xf32>
    %36 = arith.addf %30, %35 : vector<64x128xf32>
    %c23 = arith.constant 23 : index
    %c0_41 = arith.constant 0 : index
    %37 = vector.load %arg12[%c23, %c0_41] : memref<96x128xf32, #tpu.memory_space<vmem>>, vector<64x128xf32>
    %38 = arith.truncf %37 : vector<64x128xf32> to vector<64x128xbf16>
    %c6 = arith.constant 6 : index
    %c0_42 = arith.constant 0 : index
    %c0_43 = arith.constant 0 : index
    %39 = vector.load %arg6[%c6, %c0_42, %c0_43] : memref<9x128x128xbf16, #tpu.memory_space<vmem>>, vector<1x128x128xbf16>
    %40 = vector.shape_cast %39 : vector<1x128x128xbf16> to vector<128x128xbf16>
    %cst_44 = arith.constant dense<0.000000e+00> : vector<64x128xf32>
    %41 = tpu.matmul %38, %40, %cst_44 {dimension_numbers = #tpu.dot_dimension_numbers<[1], [0], [0], [1], [0, 0, 1, 1], [], []>} : vector<64x128xbf16>, vector<128x128xbf16>, vector<64x128xf32> -> vector<64x128xf32>
    %42 = arith.addf %36, %41 : vector<64x128xf32>
    %43 = vector.broadcast %24 : vector<64x1xf32> to vector<64x128xf32>
    %44 = arith.mulf %42, %43 : vector<64x128xf32>
    %c8 = arith.constant 8 : index
    %c0_45 = arith.constant 0 : index
    %45 = vector.load %arg12[%c8, %c0_45] : memref<96x128xf32, #tpu.memory_space<vmem>>, vector<64x128xf32>
    %46 = arith.truncf %45 : vector<64x128xf32> to vector<64x128xbf16>
    %c1_46 = arith.constant 1 : index
    %c0_47 = arith.constant 0 : index
    %c0_48 = arith.constant 0 : index
    %47 = vector.load %arg6[%c1_46, %c0_47, %c0_48] : memref<9x128x128xbf16, #tpu.memory_space<vmem>>, vector<1x128x128xbf16>
    %48 = vector.shape_cast %47 : vector<1x128x128xbf16> to vector<128x128xbf16>
    %cst_49 = arith.constant dense<0.000000e+00> : vector<64x128xf32>
    %49 = tpu.matmul %46, %48, %cst_49 {dimension_numbers = #tpu.dot_dimension_numbers<[1], [0], [0], [1], [0, 0, 1, 1], [], []>} : vector<64x128xbf16>, vector<128x128xbf16>, vector<64x128xf32> -> vector<64x128xf32>
    %c16_50 = arith.constant 16 : index
    %c0_51 = arith.constant 0 : index
    %50 = vector.load %arg12[%c16_50, %c0_51] : memref<96x128xf32, #tpu.memory_space<vmem>>, vector<64x128xf32>
    %51 = arith.truncf %50 : vector<64x128xf32> to vector<64x128xbf16>
    %c4 = arith.constant 4 : index
    %c0_52 = arith.constant 0 : index
    %c0_53 = arith.constant 0 : index
    %52 = vector.load %arg6[%c4, %c0_52, %c0_53] : memref<9x128x128xbf16, #tpu.memory_space<vmem>>, vector<1x128x128xbf16>
    %53 = vector.shape_cast %52 : vector<1x128x128xbf16> to vector<128x128xbf16>
    %cst_54 = arith.constant dense<0.000000e+00> : vector<64x128xf32>
    %54 = tpu.matmul %51, %53, %cst_54 {dimension_numbers = #tpu.dot_dimension_numbers<[1], [0], [0], [1], [0, 0, 1, 1], [], []>} : vector<64x128xbf16>, vector<128x128xbf16>, vector<64x128xf32> -> vector<64x128xf32>
    %55 = arith.addf %49, %54 : vector<64x128xf32>
    %c24 = arith.constant 24 : index
    %c0_55 = arith.constant 0 : index
    %56 = vector.load %arg12[%c24, %c0_55] : memref<96x128xf32, #tpu.memory_space<vmem>>, vector<64x128xf32>
    %57 = arith.truncf %56 : vector<64x128xf32> to vector<64x128xbf16>
    %c7_56 = arith.constant 7 : index
    %c0_57 = arith.constant 0 : index
    %c0_58 = arith.constant 0 : index
    %58 = vector.load %arg6[%c7_56, %c0_57, %c0_58] : memref<9x128x128xbf16, #tpu.memory_space<vmem>>, vector<1x128x128xbf16>
    %59 = vector.shape_cast %58 : vector<1x128x128xbf16> to vector<128x128xbf16>
    %cst_59 = arith.constant dense<0.000000e+00> : vector<64x128xf32>
    %60 = tpu.matmul %57, %59, %cst_59 {dimension_numbers = #tpu.dot_dimension_numbers<[1], [0], [0], [1], [0, 0, 1, 1], [], []>} : vector<64x128xbf16>, vector<128x128xbf16>, vector<64x128xf32> -> vector<64x128xf32>
    %61 = arith.addf %55, %60 : vector<64x128xf32>
    %62 = arith.addf %44, %61 : vector<64x128xf32>
    %c9 = arith.constant 9 : index
    %c0_60 = arith.constant 0 : index
    %63 = vector.load %arg12[%c9, %c0_60] : memref<96x128xf32, #tpu.memory_space<vmem>>, vector<64x128xf32>
    %64 = arith.truncf %63 : vector<64x128xf32> to vector<64x128xbf16>
    %c2_61 = arith.constant 2 : index
    %c0_62 = arith.constant 0 : index
    %c0_63 = arith.constant 0 : index
    %65 = vector.load %arg6[%c2_61, %c0_62, %c0_63] : memref<9x128x128xbf16, #tpu.memory_space<vmem>>, vector<1x128x128xbf16>
    %66 = vector.shape_cast %65 : vector<1x128x128xbf16> to vector<128x128xbf16>
    %cst_64 = arith.constant dense<0.000000e+00> : vector<64x128xf32>
    %67 = tpu.matmul %64, %66, %cst_64 {dimension_numbers = #tpu.dot_dimension_numbers<[1], [0], [0], [1], [0, 0, 1, 1], [], []>} : vector<64x128xbf16>, vector<128x128xbf16>, vector<64x128xf32> -> vector<64x128xf32>
    %c17 = arith.constant 17 : index
    %c0_65 = arith.constant 0 : index
    %68 = vector.load %arg12[%c17, %c0_65] : memref<96x128xf32, #tpu.memory_space<vmem>>, vector<64x128xf32>
    %69 = arith.truncf %68 : vector<64x128xf32> to vector<64x128xbf16>
    %c5 = arith.constant 5 : index
    %c0_66 = arith.constant 0 : index
    %c0_67 = arith.constant 0 : index
    %70 = vector.load %arg6[%c5, %c0_66, %c0_67] : memref<9x128x128xbf16, #tpu.memory_space<vmem>>, vector<1x128x128xbf16>
    %71 = vector.shape_cast %70 : vector<1x128x128xbf16> to vector<128x128xbf16>
    %cst_68 = arith.constant dense<0.000000e+00> : vector<64x128xf32>
    %72 = tpu.matmul %69, %71, %cst_68 {dimension_numbers = #tpu.dot_dimension_numbers<[1], [0], [0], [1], [0, 0, 1, 1], [], []>} : vector<64x128xbf16>, vector<128x128xbf16>, vector<64x128xf32> -> vector<64x128xf32>
    %73 = arith.addf %67, %72 : vector<64x128xf32>
    %c25 = arith.constant 25 : index
    %c0_69 = arith.constant 0 : index
    %74 = vector.load %arg12[%c25, %c0_69] : memref<96x128xf32, #tpu.memory_space<vmem>>, vector<64x128xf32>
    %75 = arith.truncf %74 : vector<64x128xf32> to vector<64x128xbf16>
    %c8_70 = arith.constant 8 : index
    %c0_71 = arith.constant 0 : index
    %c0_72 = arith.constant 0 : index
    %76 = vector.load %arg6[%c8_70, %c0_71, %c0_72] : memref<9x128x128xbf16, #tpu.memory_space<vmem>>, vector<1x128x128xbf16>
    %77 = vector.shape_cast %76 : vector<1x128x128xbf16> to vector<128x128xbf16>
    %cst_73 = arith.constant dense<0.000000e+00> : vector<64x128xf32>
    %78 = tpu.matmul %75, %77, %cst_73 {dimension_numbers = #tpu.dot_dimension_numbers<[1], [0], [0], [1], [0, 0, 1, 1], [], []>} : vector<64x128xbf16>, vector<128x128xbf16>, vector<64x128xf32> -> vector<64x128xf32>
    %79 = arith.addf %73, %78 : vector<64x128xf32>
    %80 = vector.broadcast %25 : vector<64x1xf32> to vector<64x128xf32>
    %81 = arith.mulf %79, %80 : vector<64x128xf32>
    %82 = arith.addf %62, %81 : vector<64x128xf32>
    %c0_74 = arith.constant 0 : index
    %c0_75 = arith.constant 0 : index
    %83 = vector.load %arg7[%c0_74, %c0_75] : memref<1x128xf32, #tpu.memory_space<vmem>>, vector<1x128xf32>
    %84 = vector.broadcast %83 : vector<1x128xf32> to vector<64x128xf32>
    %85 = arith.mulf %82, %84 : vector<64x128xf32>
    %c0_76 = arith.constant 0 : index
    %c0_77 = arith.constant 0 : index
    %86 = vector.load %arg8[%c0_76, %c0_77] : memref<1x128xf32, #tpu.memory_space<vmem>>, vector<1x128xf32>
    %87 = vector.broadcast %86 : vector<1x128xf32> to vector<64x128xf32>
    %88 = arith.addf %85, %87 : vector<64x128xf32>
    %cst_78 = arith.constant 0.000000e+00 : f32
    %89 = vector.broadcast %cst_78 : f32 to vector<64x128xf32>
    %90 = arith.maximumf %88, %89 : vector<64x128xf32>
    %91 = arith.truncf %90 : vector<64x128xf32> to vector<64x128xbf16>
    %c0_79 = arith.constant 0 : index
    %c0_80 = arith.constant 0 : index
    %92 = vector.load %arg9[%c0_79, %c0_80] : memref<128x128xbf16, #tpu.memory_space<vmem>>, vector<128x128xbf16>
    %cst_81 = arith.constant dense<0.000000e+00> : vector<64x128xf32>
    %93 = tpu.matmul %91, %92, %cst_81 {dimension_numbers = #tpu.dot_dimension_numbers<[1], [0], [0], [1], [0, 0, 1, 1], [], []>} : vector<64x128xbf16>, vector<128x128xbf16>, vector<64x128xf32> -> vector<64x128xf32>
    %c0_82 = arith.constant 0 : index
    %c0_83 = arith.constant 0 : index
    %94 = vector.load %arg10[%c0_82, %c0_83] : memref<1x128xf32, #tpu.memory_space<vmem>>, vector<1x128xf32>
    %95 = vector.broadcast %94 : vector<1x128xf32> to vector<64x128xf32>
    %96 = arith.addf %93, %95 : vector<64x128xf32>
    %cst_84 = arith.constant 0.000000e+00 : f32
    %97 = vector.broadcast %cst_84 : f32 to vector<64x128xf32>
    %98 = arith.subf %97, %96 : vector<64x128xf32>
    %99 = math.exp %98 : vector<64x128xf32>
    %cst_85 = arith.constant 1.000000e+00 : f32
    %100 = vector.broadcast %cst_85 : f32 to vector<64x128xf32>
    %101 = arith.addf %100, %99 : vector<64x128xf32>
    %102 = tpu.reciprocal %101 {approx = true} : vector<64x128xf32> -> vector<64x128xf32>
    %c16_86 = arith.constant 16 : index
    %c0_87 = arith.constant 0 : index
    %103 = vector.load %arg12[%c16_86, %c0_87] : memref<96x128xf32, #tpu.memory_space<vmem>>, vector<64x128xf32>
    %104 = arith.mulf %103, %102 : vector<64x128xf32>
    %c0_88 = arith.constant 0 : index
    %c0_89 = arith.constant 0 : index
    %c0_90 = arith.constant 0 : index
    %105 = vector.load %arg11[%c0_88, %c0_89, %c0_90] : memref<1x64x128xf32, #tpu.memory_space<vmem>>, vector<1x64x128xf32>
    %106 = vector.shape_cast %105 : vector<1x64x128xf32> to vector<64x128xf32>
    %107 = vector.shape_cast %104 : vector<64x128xf32> to vector<1x64x128xf32>
    tpu.vector_store %arg11[%c0_88, %c0_89, %c0_90], %107 {strides = array<i32>} : memref<1x64x128xf32, #tpu.memory_space<vmem>>, vector<1x64x128xf32>,
    return
  }
  func.func @transform_0(%arg0: i32) -> (i32, i32, i32, i32) {
    %c0_i32 = arith.constant 0 : i32
    %c0_i32_0 = arith.constant 0 : i32
    %c0_i32_1 = arith.constant 0 : i32
    %c0_i32_2 = arith.constant 0 : i32
    return %arg0, %c0_i32, %c0_i32_0, %c0_i32_1 : i32, i32, i32, i32
  }
  func.func @transform_1(%arg0: i32) -> (i32, i32, i32) {
    %c0_i32 = arith.constant 0 : i32
    %c0_i32_0 = arith.constant 0 : i32
    %c0_i32_1 = arith.constant 0 : i32
    return %arg0, %c0_i32, %c0_i32_0 : i32, i32, i32
  }
  func.func @transform_2(%arg0: i32) -> (i32, i32) {
    %c0_i32 = arith.constant 0 : i32
    %c0_i32_0 = arith.constant 0 : i32
    %c0_i32_1 = arith.constant 0 : i32
    return %c0_i32, %c0_i32_0 : i32, i32
  }
  func.func @transform_3(%arg0: i32) -> (i32, i32) {
    %c0_i32 = arith.constant 0 : i32
    %c0_i32_0 = arith.constant 0 : i32
    %c0_i32_1 = arith.constant 0 : i32
    return %c0_i32, %c0_i32_0 : i32, i32
  }
  func.func @transform_4(%arg0: i32) -> (i32, i32) {
    %c0_i32 = arith.constant 0 : i32
    %c0_i32_0 = arith.constant 0 : i32
    %c0_i32_1 = arith.constant 0 : i32
    return %c0_i32, %c0_i32_0 : i32, i32
  }
  func.func @transform_5(%arg0: i32) -> (i32, i32, i32) {
    %c0_i32 = arith.constant 0 : i32
    %c0_i32_0 = arith.constant 0 : i32
    %c0_i32_1 = arith.constant 0 : i32
    %c0_i32_2 = arith.constant 0 : i32
    return %c0_i32, %c0_i32_0, %c0_i32_1 : i32, i32, i32
  }
  func.func @transform_6(%arg0: i32) -> (i32, i32) {
    %c0_i32 = arith.constant 0 : i32
    %c0_i32_0 = arith.constant 0 : i32
    %c0_i32_1 = arith.constant 0 : i32
    return %c0_i32, %c0_i32_0 : i32, i32
  }
  func.func @transform_7(%arg0: i32) -> (i32, i32) {
    %c0_i32 = arith.constant 0 : i32
    %c0_i32_0 = arith.constant 0 : i32
    %c0_i32_1 = arith.constant 0 : i32
    return %c0_i32, %c0_i32_0 : i32, i32
  }
  func.func @transform_8(%arg0: i32) -> (i32, i32) {
    %c0_i32 = arith.constant 0 : i32
    %c0_i32_0 = arith.constant 0 : i32
    %c0_i32_1 = arith.constant 0 : i32
    return %c0_i32, %c0_i32_0 : i32, i32
  }
  func.func @transform_9(%arg0: i32) -> (i32, i32) {
    %c0_i32 = arith.constant 0 : i32
    %c0_i32_0 = arith.constant 0 : i32
    %c0_i32_1 = arith.constant 0 : i32
    return %c0_i32, %c0_i32_0 : i32, i32
  }
  func.func @transform_10(%arg0: i32) -> (i32, i32, i32) {
    %c0_i32 = arith.constant 0 : i32
    %c0_i32_0 = arith.constant 0 : i32
    %c0_i32_1 = arith.constant 0 : i32
    return %arg0, %c0_i32, %c0_i32_0 : i32, i32, i32
  }
}

</mosaic_0001>

<bundles_post_ra>
// kernel: tpu_custom_call.1
= control target key start
LH: loop header
LB: loop body
LE: loop exit
PB: predicated region body
PF: predicated region fallthrough
CT: control target
= control target key end

     0   :  { %15 = vsyncpa [#allocation4], 0  ;;  %s3885_s0 = inlined_call_operand.vmem [shape: f32[2,4,64,4], index: 0, kind: input, shape index: {}]   ;;  %s3886_s1 = inlined_call_operand.vmem [shape: bf16[2,64,36], index: 1, kind: input, shape index: {}]   ;;  %s3887_s2 = inlined_call_operand.vmem [shape: f32[64,2], index: 2, kind: input, shape index: {}]   ;;  %s3888_s3 = inlined_call_operand.vmem [shape: bf16[36,128], index: 3, kind: input, shape index: {}]   ;;  %s3889_s4 = inlined_call_operand.vmem [shape: f32[1,128], index: 4, kind: input, shape index: {}]   ;;  %s3890_s5 = inlined_call_operand.vmem [shape: bf16[9,128,128], index: 5, kind: input, shape index: {}]   ;;  %s3891_s6 = inlined_call_operand.vmem [shape: f32[1,128], index: 6, kind: input, shape index: {}]   ;;  %s3892_s7 = inlined_call_operand.vmem [shape: f32[1,128], index: 7, kind: input, shape index: {}]   ;;  %s3893_s8 = inlined_call_operand.vmem [shape: bf16[128,128], index: 8, kind: input, shape index: {}]   ;;  %s3894_s9 = inlined_call_operand.vmem [shape: f32[1,128], index: 9, kind: input, shape index: {}]   ;;  %s3895_s10 = inlined_call_operand.hbm [shape: f32[2,64,128], index: 10, kind: output, shape index: {}]  }
   0x1   :  { %17 = vsyncpa [#allocation4 + $0x1], 0  ;;  %s3298_s13 = smov 0   ;;  %s3300_s14 = smov 0  }
   0x2   :  { %s3302_s15 = smov 0   ;;  %s3304_s16 = smov 0  }
   0x3 LB: > { %s3319_s17 = sadd.s32 4294967295, %s3235_s16   ;;  %s2310_s18 = sadd.s32 4294967294, %s3235_s16   ;;  %s3235_s16 = sphi %s3304_s16, %s3901_s16   ;;  %s3231_s15 = sphi %s3302_s15, %s3900_s15   ;;  %s3227_s14 = sphi %s3300_s14, %s3899_s14   ;;  %s3223_s13 = sphi %s3298_s13, %s3898_s13  }
   0x4   : > { %s3323_s19 = sadd.s32 1, %s3235_s16   ;;  %s250_s20 = sadd.s32 1, %s3231_s15 }
   0x5   : > { %s247_s21 = ssub.s32 %s3235_s16, %s3323_s19  ;;  %p260_p0 = scmp.ne.s32.totalorder %s3231_s15, %s3227_s14 }
   0x6   : > { %p248_p1 = scmp.eq.s32.totalorder %s247_s21, 0  ;;  %p261_p2 = scmp.eq.s32.totalorder %s3319_s17, 1 }
   0x7   : > { %p266_p3 = scmp.ne.s32.totalorder %s3227_s14, %s3223_s13  ;;  %p267_p4 = scmp.eq.s32.totalorder %s2310_s18, 1 }
   0x8   : > { %s3334_s22 = scalar_select %p248_p1, %s3231_s15, %s250_s20  }
   0x9   : > { %p3336_p5 = por %p261_p2, %p260_p0  ;;  %p3340_p6 = por %p267_p4, %p266_p3 }
   0xa   : > { %p2313_p7 = scmp.ge.s32.totalorder %s3235_s16, 1  ;;  %p325_p8 = scmp.lt.s32.totalorder %s3235_s16, 3 }
   0xc   : > { %p326_p9 = pnand %p2313_p7, %p325_p8 }
   0xd   : > { %v3054_v0 = vld [vmem:[%s3888_s3] sm:$0xff] (!%p326_p9)   ;;  %v3055_v1 = vld [vmem:[%s3888_s3 + $0x8] sm:$0xff] (!%p326_p9)   ;;  %p368_p10 = scmp.lt.s32.totalorder (!%p326_p9), %s3319_s17, 1  ;;  %v3056_v2 = vld [vmem:[%s3888_s3 + $0x10] ss:$0 sps:$4 sm:$0x33] (!%p326_p9)  }
   0xe   : > { %329 = sbr.rel (%p326_p9) target bundleno = 881 (0x371), region = 60  ;;  %2701 = vmatprep.subr.bf16.mxu0 (!%p326_p9), %v3054_v0  ;;  %v3061_v3 = vld [vmem:[%s3890_s5] sm:$0xff] (!%p326_p9)   ;;  %vm506_vm0 = vcmask (!%p326_p9), 1041408   ;;  %vm493_vm1 = vcmask (!%p326_p9), 293888   ;;  %v3063_v4 = vld [vmem:[%s3890_s5 + $0x8] sm:$0xff] (!%p326_p9)   ;;  %v3065_v11 = vld [vmem:[%s3890_s5 + $0x10] sm:$0xff] (!%p326_p9)  }
   0xf   : > { %2702 = vmatpush3.bf16.msra.mxu0 (!%p326_p9), %v3054_v0  ;;  %2739 = vmatprep.subr.bf16.mxu1 (!%p326_p9), %v3061_v3  ;;  %v508_v6 = vsel (!%p326_p9), %vm506_vm0, %v3056_v2, 0  ;;  %v3062_v7 = vld [vmem:[%s3890_s5 + $0xc0] sm:$0xff] (!%p326_p9)   ;;  %v3064_v10 = vld [vmem:[%s3890_s5 + $0xc8] sm:$0xff] (!%p326_p9)   ;;  %v3067_v12 = vld [vmem:[%s3890_s5 + $0x18] sm:$0xff] (!%p326_p9)   ;;  %v3237_v21 = vmov (!%p326_p9), 0.0   ;;  %v3238_v27 = vmov (!%p326_p9), 0  }
  0x10   : > { %2703 = vmatprep.subr.bf16.mxu0 (!%p326_p9), %v3055_v1  ;;  %2740 = vmatpush3.bf16.msra.mxu1 (!%p326_p9), %v3061_v3  ;;  %v3066_v14 = vld [vmem:[%s3890_s5 + $0xd0] sm:$0xff] (!%p326_p9)   ;;  %v3068_v15 = vld [vmem:[%s3890_s5 + $0xd8] sm:$0xff] (!%p326_p9)   ;;  %v3069_v16 = vld [vmem:[%s3890_s5 + $0x20] sm:$0xff] (!%p326_p9)   ;;  %575 = vst [vmem:[#allocation2] sm:$0xff] (!%p326_p9), %v3237_v21  ;;  %v3239_v58 = vmov (!%p326_p9), 1   ;;  %vm587_vm2 = vcmask (!%p326_p9), 31744  }
  0x11   : > { %2741 = vmatprep.subr.bf16.mxu1 (!%p326_p9), %v3063_v4  ;;  %v3070_v17 = vld [vmem:[%s3890_s5 + $0xe0] sm:$0xff] (!%p326_p9)   ;;  %v3071_v18 = vld [vmem:[%s3890_s5 + $0x28] sm:$0xff] (!%p326_p9)   ;;  %v3073_v20 = vld [vmem:[%s3890_s5 + $0x30] sm:$0xff] (!%p326_p9)   ;;  %576 = vst [vmem:[#allocation2 + $0x8] sm:$0xff] (!%p326_p9), %v3237_v21  ;;  %3049 = vset.pattern.permute.xlu1 (!%p326_p9), %v3238_v27  ;;  %s365_s30 = sand.u32 (!%p326_p9), 1, %s3227_s14   ;;  %s2573_s18 = sshll.u32 (!%p326_p9), %s3319_s17, 10 }
  0x12   : > { %v3072_v19 = vld [vmem:[%s3890_s5 + $0xe8] sm:$0xff] (!%p326_p9)   ;;  %577 = vst [vmem:[#allocation2 + $0x50] sm:$0xff] (!%p326_p9), %v3237_v21  ;;  %578 = vst [vmem:[#allocation2 + $0x58] sm:$0xff] (!%p326_p9), %v3237_v21  ;;  %v3074_v22 = vld [vmem:[%s3890_s5 + $0xf0] sm:$0xff] (!%p326_p9)   ;;  %3048 = vset.pattern.permute.xlu0 (!%p326_p9), %v3238_v27  ;;  %s2314_s12 = sshll.u32 (!%p326_p9), %s365_s30, 6  ;;  %s3240_s28 = smov (!%p326_p9), [#allocation3]  }
  0x13   : > { %2704 = vmatpush3.bf16.msra.mxu0 (!%p326_p9), %v3055_v1  ;;  %v3075_v23 = vld [vmem:[%s3890_s5 + $0x38] sm:$0xff] (!%p326_p9)   ;;  %v3422_v25 = vld [vmem:[%s3890_s5 + $0x180] sm:$0xff] (!%p326_p9)   ;;  %v3442_v28 = vld [vmem:[%s3887_s2 + $0x10] sm:$0xff] (!%p326_p9)  ;;  %s3177_s29 = sshll.u32 (!%p326_p9), %s3240_s28, 4  ;;  %s3178_s29 = int_to_ptr.vmem [resolvable:$false] %s3177_s29 }
  0x14   : > { %3003 = vmatprep.subr.msk.bf16.mxu0 (!%p326_p9), %vm506_vm0, %v3056_v2  ;;  %2742 = vmatpush3.bf16.msra.mxu1 (!%p326_p9), %v3063_v4  ;;  %v3076_v24 = vld [vmem:[%s3890_s5 + $0xf8] sm:$0xff] (!%p326_p9)   ;;  %v3427_v26 = vld [vmem:[%s3890_s5 + $0x100] sm:$0xff] (!%p326_p9)   ;;  %v597_v53 = vld [vmem:[%s3887_s2 + $0x8] sm:$0xff] (!%p326_p9) }
  0x15   : > { %s3357_s11 = scalar_select %p368_p10, %s3319_s17, 1  ;;  %2743 = vmatprep.subr.bf16.mxu1 %v3065_v11  ;;  %1042 = vperm.xlu1 %3049, %v3442_v28   ;;  %v3458_v39 = vld [vmem:[%s3887_s2 + $0x18] sm:$0xff]  ;;  %v3470_v50 = vld [vmem:[%s3889_s4] ss:$0 sm:$0xff] }
  0x16   : > { %s3844_s17 = scalar_lea.sflag [#allocation4], %s365_s30 }
  0x17   : > { %s2572_s20 = sshll.u32 %s3357_s11, 5  ;;  %2706 = vmatpush3.bf16.msra.mxu0 %v508_v6 }
  0x18   : > { %s377_s26 = scalar_lea.vmem %s3886_s1, %s2572_s20  ;;  %2715 = vmatprep.subr.bf16.mxu0 %v3062_v7  ;;  %2744 = vmatpush3.bf16.msra.mxu1 %v3065_v11 }
  0x19   : > { %v3057_v5 = vld [vmem:[%s377_s26] sm:$0xff]   ;;  %v3058_v8 = vld [vmem:[%s377_s26 + $0x8] sm:$0xff]   ;;  %v3059_v9 = vld [vmem:[%s377_s26 + $0x10] sm:$0xff]   ;;  %2745 = vmatprep.subr.bf16.mxu1 %v3067_v12  ;;  %1047 = vperm.xlu1 %3049, %v3458_v39  }
  0x1a   : > { %2707 = vmatprep.mubr.msk.bf16.mxu0 %vm493_vm1, %v3057_v5  ;;  %v3060_v13 = vld [vmem:[%s377_s26 + $0x18] sm:$0xff]   ;;  %s2571_s26 = sshll.u32 %s3357_s11, 8 }
  0x1b   : > { %2708 = vmatmul.mubr.msk.bf16.vlgmr.msra.gmra.mrb[0].mxu0 %vm493_vm1, %v3058_v8  ;;  %s3435_s21 = scalar_lea.vmem %s3885_s0, %s2571_s26  ;;  %s367_s26 = scalar_lea.vmem [#allocation3], %s2314_s12 }
  0x1c   : > { %2711 = vmatprep.mubr.msk.bf16.mxu0 %vm493_vm1, %v3059_v9  ;;  %2716 = vmatpush3.bf16.msra.mxu0 %v3062_v7  ;;  %v381_v29 = vld [vmem:[%s3435_s21 + $0x10] sm:$0xff]  ;;  %v379_v33 = vld [vmem:[%s3435_s21] sm:$0xff]  ;;  %v382_v37 = vld [vmem:[%s3435_s21 + $0x18] sm:$0xff]  ;;  %s2236_s20 = sshll.u32 %s367_s26, 4  ;;  %s3179_s12 = scalar_lea.vmem %s3178_s29, 2048  ;;  %s3839_s20 = int_to_ptr.vmem [resolvable:$true] %s2236_s20 }
  0x1d   : > { %2717 = vmatprep.subr.bf16.mxu0 %v3064_v10  ;;  %2746 = vmatpush3.bf16.msra.mxu1 %v3067_v12  ;;  %v2321_v30 = vld [vmem:[%s3435_s21 + $0x50] sm:$0xff]  ;;  %v2319_v34 = vld [vmem:[%s3435_s21 + $0x40] sm:$0xff]  ;;  %v380_v38 = vld [vmem:[%s3435_s21 + $0x8] sm:$0xff]  ;;  %s3173_s27 = scalar_lea.vmem %s3839_s20, 1024  ;;  %p3180_p0 = scmp.lt.s32.totalorder %s3839_s20, %s3178_s29 }
  0x1e   : > { %2747 = vmatprep.subr.bf16.mxu1 %v3069_v16  ;;  %v2329_v31 = vld [vmem:[%s3435_s21 + $0x90] sm:$0xff]  ;;  %v2327_v35 = vld [vmem:[%s3435_s21 + $0x80] sm:$0xff]  ;;  %v2322_v40 = vld [vmem:[%s3435_s21 + $0x58] sm:$0xff]  ;;  %v416_v43 = vmax.f32 %v381_v29, %v2321_v30  ;;  %v414_v48 = vmax.f32 %v379_v33, %v2319_v34  ;;  %3050 = vset.pattern.permute.xlu1 %v3239_v58  ;;  %p3174_p11 = scmp.ne.s32.totalorder %s3839_s20, %s3173_s27  ;;  %p3181_p1 = scmp.lt.s32.totalorder %s3179_s12, %s3173_s27 }
  0x1f   : > { %v2337_v32 = vld [vmem:[%s3435_s21 + $0xd0] sm:$0xff]  ;;  %v2335_v36 = vld [vmem:[%s3435_s21 + $0xc0] sm:$0xff]  ;;  %v2330_v41 = vld [vmem:[%s3435_s21 + $0x98] sm:$0xff]  ;;  %v417_v51 = vmax.f32 %v382_v37, %v2322_v40  ;;  %1945 = vperm.xlu1 %3050, %v597_v53  }
  0x20   : > { %2718 = vmatpush3.bf16.msra.mxu0 %v3064_v10  ;;  %v2338_v42 = vld [vmem:[%s3435_s21 + $0xd8] sm:$0xff]  ;;  %v424_v44 = vmax.f32 %v2329_v31, %v2337_v32  ;;  %v2320_v45 = vld [vmem:[%s3435_s21 + $0x48] sm:$0xff]  ;;  %v422_v49 = vmax.f32 %v2327_v35, %v2335_v36  ;;  %v385_v56 = vld [vmem:[%s3435_s21 + $0x30] sm:$0xff]  ;;  %p3175_p12 = pnand %p3174_p11, %p3336_p5  ;;  %p3182_p2 = por %p3181_p1, %p3180_p0 }
  0x21   : > { %2719 = vmatprep.subr.bf16.mxu0 %v3066_v14  ;;  %2748 = vmatpush3.bf16.msra.mxu1 %v3069_v16  ;;  %v2328_v46 = vld [vmem:[%s3435_s21 + $0x88] sm:$0xff]  ;;  %v425_v52 = vmax.f32 %v2330_v41, %v2338_v42  ;;  %v415_v54 = vmax.f32 %v380_v38, %v2320_v45  ;;  %v2325_v57 = vld [vmem:[%s3435_s21 + $0x70] sm:$0xff]  ;;  %v383_v63 = vld [vmem:[%s3435_s21 + $0x20] sm:$0xff] }
  0x22   : > { %2749 = vmatprep.subr.bf16.mxu1 %v3071_v18  ;;  %v2336_v47 = vld [vmem:[%s3435_s21 + $0xc8] sm:$0xff]  ;;  %v432_v59 = vmax.f32 %v416_v43, %v424_v44  ;;  %v2333_v61 = vld [vmem:[%s3435_s21 + $0xb0] sm:$0xff]  ;;  %v430_v1 = vmax.f32 %v414_v48, %v422_v49  ;;  %v2323_v3 = vld [vmem:[%s3435_s21 + $0x60] sm:$0xff]  ;;  %p3176_p13 = pneg %p3175_p12 }
  0x23   : > { %2712 = vmatmul.mubr.msk.bf16.gmra.mrb[4].mxu0 %vm493_vm1, %v3060_v13  ;;  %v423_v55 = vmax.f32 %v2328_v46, %v2336_v47  ;;  %v2341_v62 = vld [vmem:[%s3435_s21 + $0xf0] sm:$0xff]  ;;  %v2331_v4 = vld [vmem:[%s3435_s21 + $0xa0] sm:$0xff]  ;;  %v433_v7 = vmax.f32 %v417_v51, %v425_v52  ;;  %v386_v9 = vld [vmem:[%s3435_s21 + $0x38] sm:$0xff]  ;;  %1949 = vperm.xlu1 %3050, %v3442_v28   ;;  %v418_v29 = vmax.f32 %v383_v63, %v2323_v3 }
  0x24   : > { %2720 = vmatpush3.bf16.msra.mxu0 %v3066_v14  ;;  %v2339_v5 = vld [vmem:[%s3435_s21 + $0xe0] sm:$0xff]  ;;  %v2326_v10 = vld [vmem:[%s3435_s21 + $0x78] sm:$0xff]  ;;  %v384_v16 = vld [vmem:[%s3435_s21 + $0x28] sm:$0xff]  ;;  %p3183_p3 = pnand %p3182_p2, %p3176_p13 }
  0x25   : > { %2721 = vmatprep.subr.bf16.mxu0 %v3068_v15  ;;  %2750 = vmatpush3.bf16.msra.mxu1 %v3071_v18  ;;  %v2334_v11 = vld [vmem:[%s3435_s21 + $0xb8] sm:$0xff]  ;;  %v431_v13 = vmax.f32 %v415_v54, %v423_v55  ;;  %v426_v30 = vmax.f32 %v2331_v4, %v2339_v5  ;;  %v421_v31 = vmax.f32 %v386_v9, %v2326_v10  ;;  %v3509_v33 = vld [vmem:[%s3887_s2 + $0x20] sm:$0xff]  ;;  %v3519_v45 = vld [vmem:[%s3887_s2 + $0x30] sm:$0xff] }
  0x26   : > { %2751 = vmatprep.subr.bf16.mxu1 %v3073_v20  ;;  %v604_v41 = vld [vmem:[#allocation2 + $0x7] sm:$0xff]  ;;  %v3082_v63 = vld [vmem:[%s3890_s5 + $0x110] sm:$0xff]   ;;  %v3083_v5 = vld [vmem:[%s3890_s5 + $0x198] sm:$0xff]  }
  0x27   : > { %3051 = vset.pattern.permute.xlu1 %v3238_v27  ;;  %v434_v38 = vmax.f32 %v418_v29, %v426_v30  ;;  %v3084_v9 = vld [vmem:[%s3890_s5 + $0x118] sm:$0xff]   ;;  %v3095_v29 = vld [vmem:[%s3890_s5 + $0x148] sm:$0xff]  }
  0x28   : > { %2722 = vmatpush3.bf16.msra.mxu0 %v3068_v15  ;;  %v2342_v15 = vld [vmem:[%s3435_s21 + $0xf8] sm:$0xff]  ;;  %1052 = vperm.xlu1 %3051, %v3509_v33   ;;  %v3096_v30 = vld [vmem:[%s3890_s5 + $0x48] sm:$0xff]  }
  0x29   : > { %2723 = vmatprep.subr.bf16.mxu0 %v3070_v17  ;;  %2752 = vmatpush3.bf16.msra.mxu1 %v3073_v20  ;;  %v428_v20 = vmax.f32 %v2333_v61, %v2341_v62  ;;  %v429_v32 = vmax.f32 %v2334_v11, %v2342_v15  ;;  %v601_v61 = vld [vmem:[%s3887_s2 + $0x28] sm:$0xff]  ;;  %v3081_v62 = vld [vmem:[%s3890_s5 + $0x190] sm:$0xff]   ;;  %v3085_v11 = vld [vmem:[%s3890_s5 + $0x1a0] sm:$0xff]  }
  0x2a   : > { %2753 = vmatprep.subr.bf16.mxu1 %v3075_v23  ;;  %v3089_v15 = vld [vmem:[%s3890_s5 + $0x1b0] sm:$0xff]  }
  0x2b   : > { %v437_v43 = vmax.f32 %v421_v31, %v429_v32 }
  0x2c   : > { %2724 = vmatpush3.bf16.msra.mxu0 %v3070_v17  ;;  %v3495_v17 = vld [vmem:[%s3887_s2] sm:$0xff]  ;;  %1062 = vperm.xlu1 %3051, %v3519_v45  }
  0x2d   : > { %2725 = vmatprep.subr.bf16.mxu0 %v3072_v19  ;;  %2754 = vmatpush3.bf16.msra.mxu1 %v3075_v23  ;;  %v2332_v23 = vld [vmem:[%s3435_s21 + $0xa8] sm:$0xff] }
  0x2e   : > { %2763 = vmatprep.subr.bf16.mxu1 %v3422_v25  ;;  %1032 = vperm.xlu0 %3048, %v3495_v17  }
  0x30   : > { %2726 = vmatpush3.bf16.msra.mxu0 %v3072_v19  ;;  %v420_v19 = vmax.f32 %v385_v56, %v2325_v57 }
  0x31   : > { %2727 = vmatprep.subr.bf16.mxu0 %v3074_v22 }
  0x32   : > { %v436_v35 = vmax.f32 %v420_v19, %v428_v20  ;;  %1037 = vperm.xlu0 %3048, %v597_v53   ;;  %v3094_v20 = vld [vmem:[%s3890_s5 + $0x40] sm:$0xff]  }
  0x34   : > { %2728 = vmatpush3.bf16.msra.mxu0 %v3074_v22  ;;  %v2324_v22 = vld [vmem:[%s3435_s21 + $0x68] sm:$0xff] }
  0x35   : > { %2729 = vmatprep.subr.bf16.mxu0 %v3076_v24  ;;  %v419_v28 = vmax.f32 %v384_v16, %v2324_v22  ;;  %v3090_v16 = vld [vmem:[%s3890_s5 + $0x130] sm:$0xff]  }
  0x36   : > { %1057 = vperm.xlu0 %3048, %v601_v61  }
  0x38   : > { %2730 = vmatpush3.bf16.msra.mxu0 %v3076_v24  ;;  %v2340_v24 = vld [vmem:[%s3435_s21 + $0xe8] sm:$0xff]  ;;  %s3837_s21 = scalar_lea.hbm %s3895_s10, %s2573_s18 }
  0x39   : > { %2787 = vmatprep.subr.bf16.mxu0 %v3427_v26  ;;  %v427_v34 = vmax.f32 %v2332_v23, %v2340_v24 }
  0x3a   : > { %3052 = vset.pattern.permute.xlu0 %v3239_v58 }
  0x3b   : > { %v435_v46 = vmax.f32 %v419_v28, %v427_v34  ;;  %1941 = vperm.xlu0 %3052, %v3495_v17   ;;  %v3093_v17 = vld [vmem:[%s3890_s5 + $0x140] sm:$0xff]  }
  0x3f   : > { %1953 = vperm.xlu0 %3052, %v3458_v39   ;;  %v3091_v39 = vld [vmem:[%s3890_s5 + $0x1b8] sm:$0xff]  }
  0x43   : > { %1957 = vperm.xlu0 %3052, %v3509_v33   ;;  %v3097_v33 = vld [vmem:[%s3890_s5 + $0x150] sm:$0xff]  }
  0xee   : > { %v2709_v60 = vpop.f32.mrb[0].mxu0 }
  0xef   : > { %v553_v0 = vadd.f32 %v2709_v60, %v3470_v50  ;;  %v544_v2 = vpop.f32.mrb[1].mxu0  ;;  %v3537_v60 = vld [vmem:[%s3887_s2 + $0x38] sm:$0xff] }
  0xf0   : > { %v545_v6 = vadd.f32 %v3470_v50, %v544_v2  ;;  %v2710_v8 = vpop.f32.mrb[2].mxu0  ;;  %1067 = vperm.xlu1 %3051, %v3537_v60   ;;  %1969 = vperm.xlu0 %3052, %v3537_v60  }
  0xf1   : > { %581 = vst [vmem:[#allocation2 + $0x20] sm:$0xff] %v553_v0  ;;  %v556_v12 = vadd.f32 %v2710_v8, %v3470_v50  ;;  %v547_v14 = vpop.f32.mrb[3].mxu0 }
  0xf2   : > { %590 = vst.msk [vmem:[#allocation2 + $0x20] sm:$0xff] %vm587_vm2, %v432_v59  ;;  %579 = vst [vmem:[#allocation2 + $0x10] sm:$0xff] %v545_v6  ;;  %v548_v18 = vadd.f32 %v3470_v50, %v547_v14  ;;  %v3080_v59 = vld [vmem:[%s3890_s5 + $0x108] sm:$0xff]  }
  0xf3   : > { %588 = vst.msk [vmem:[#allocation2 + $0x10] sm:$0xff] %vm587_vm2, %v430_v1  ;;  %582 = vst [vmem:[#allocation2 + $0x28] sm:$0xff] %v556_v12  ;;  %v3086_v12 = vld [vmem:[%s3890_s5 + $0x120] sm:$0xff]   ;;  %v3088_v14 = vld [vmem:[%s3890_s5 + $0x128] sm:$0xff]  }
  0xf4   : > { %591 = vst.msk [vmem:[#allocation2 + $0x28] sm:$0xff] %vm587_vm2, %v433_v7  ;;  %580 = vst [vmem:[#allocation2 + $0x18] sm:$0xff] %v548_v18  ;;  %3053 = vset.pattern.permute.xlu1 %v3239_v58  ;;  %v3092_v58 = vld [vmem:[%s3890_s5 + $0x138] sm:$0xff]  }
  0xf5   : > { %589 = vst.msk [vmem:[#allocation2 + $0x18] sm:$0xff] %vm587_vm2, %v431_v13  ;;  %v3087_v13 = vld [vmem:[%s3890_s5 + $0x1a8] sm:$0xff]   ;;  %1961 = vperm.xlu1 %3053, %v601_v61  }
  0xf6   : > { %v2713_v36 = vpop.f32.mrb[4].mxu0  ;;  %v3111_v61 = vld [vmem:[%s3890_s5 + $0x88] sm:$0xff]  }
  0xf7   : > { %v569_v37 = vadd.f32 %v2713_v36, %v3470_v50  ;;  %v560_v40 = vpop.f32.mrb[5].mxu0 }
  0xf8   : > { %v561_v42 = vadd.f32 %v3470_v50, %v560_v40  ;;  %v2714_v44 = vpop.f32.mrb[6].mxu0 }
  0xf9   : > { %585 = vst [vmem:[#allocation2 + $0x40] sm:$0xff] %v569_v37  ;;  %v572_v27 = vadd.f32 %v2714_v44, %v3470_v50  ;;  %v563_v47 = vpop.f32.mrb[7].mxu0  ;;  %1965 = vperm.xlu1 %3053, %v3519_v45   ;;  %v3606_v18 = vld [vmem:[#allocation2 + $0x20] sm:$0xff] }
  0xfa   : > { %v605_v48 = vld [vmem:[#allocation2 + $0xf] sm:$0xff]  ;;  %594 = vst.msk [vmem:[#allocation2 + $0x40] sm:$0xff] %vm587_vm2, %v436_v35  ;;  %583 = vst [vmem:[#allocation2 + $0x30] sm:$0xff] %v561_v42  ;;  %v564_v49 = vadd.f32 %v3470_v50, %v563_v47  ;;  %v3100_v42 = vld [vmem:[%s3890_s5 + $0x58] sm:$0xff]  }
  0xfb   : > { %v612_v51 = vpack.c.bf16 %v605_v48, %v604_v41  ;;  %v608_v52 = vld [vmem:[#allocation2 + $0x27] sm:$0xff]  ;;  %592 = vst.msk [vmem:[#allocation2 + $0x30] sm:$0xff] %vm587_vm2, %v434_v38  ;;  %586 = vst [vmem:[#allocation2 + $0x48] sm:$0xff] %v572_v27  ;;  %v3555_v2 = vld [vmem:[#allocation2 + $0x10] sm:$0xff] }
  0xfc   : > { %v606_v53 = vld [vmem:[#allocation2 + $0x17] sm:$0xff]  ;;  %v607_v54 = vld [vmem:[#allocation2 + $0x1f] sm:$0xff]  ;;  %595 = vst.msk [vmem:[#allocation2 + $0x48] sm:$0xff] %vm587_vm2, %v437_v43  ;;  %584 = vst [vmem:[#allocation2 + $0x38] sm:$0xff] %v564_v49  ;;  %v1086_v44 = vpack.c.bf16 %v3555_v2, %v3237_v21 }
  0xfd   : > { %v633_v55 = vpack.c.bf16 %v606_v53, %v605_v48  ;;  %2755 = vmatprep.mubr.bf16.mxu1 %v612_v51  ;;  %v613_v56 = vpack.c.bf16 %v607_v54, %v606_v53  ;;  %v634_v57 = vpack.c.bf16 %v608_v52, %v607_v54  ;;  %v3079_v50 = vld [vmem:[%s3890_s5 + $0x188] sm:$0xff]   ;;  %593 = vst.msk [vmem:[#allocation2 + $0x38] sm:$0xff] %vm587_vm2, %v435_v46  ;;  %v3557_v4 = vld [vmem:[#allocation2 + $0x18] sm:$0xff]  ;;  %v3098_v35 = vld [vmem:[%s3890_s5 + $0x50] sm:$0xff]  }
  0xfe   : > { %v1108_v10 = vpack.c.bf16 %v3557_v4, %v3555_v2  ;;  %v3608_v19 = vld [vmem:[#allocation2 + $0x28] sm:$0xff]  ;;  %v3640_v37 = vld [vmem:[#allocation2 + $0x11] sm:$0xff]  ;;  %v3642_v38 = vld [vmem:[#allocation2 + $0x19] sm:$0xff] }
  0xff   : > { %2731 = vmatprep.mubr.bf16.mxu0 %v633_v55  ;;  %2756 = vmatmul.mubr.bf16.vlgmr.msra.gmra.mrb[0].mxu1 %v613_v56  ;;  %v1109_v22 = vpack.c.bf16 %v3608_v19, %v3606_v18  ;;  %v3099_v41 = vld [vmem:[%s3890_s5 + $0x158] sm:$0xff]   ;;  %v1543_v43 = vpack.c.bf16 %v3642_v38, %v3640_v37  ;;  %v3101_v45 = vld [vmem:[%s3890_s5 + $0x160] sm:$0xff]   ;;  %v3103_v46 = vld [vmem:[%s3890_s5 + $0x168] sm:$0xff]  }
 0x100   : > { %2764 = vmatpush3.bf16.msra.mxu1 %v3422_v25  ;;  %2732 = vmatmul.mubr.bf16.vlgmr.msra.gmra.mrb[8].mxu0 %v634_v57  ;;  %v3102_v27 = vld [vmem:[%s3890_s5 + $0x60] sm:$0xff]   ;;  %v3104_v47 = vld [vmem:[%s3890_s5 + $0x68] sm:$0xff]   ;;  %v3105_v48 = vld [vmem:[%s3890_s5 + $0x170] sm:$0xff]  }
 0x101   : > { %2788 = vmatpush3.bf16.msra.mxu0 %v3427_v26  ;;  %2765 = vmatprep.subr.bf16.mxu1 %v3079_v50  ;;  %v3631_v28 = vld [vmem:[#allocation2 + $0x40] sm:$0xff]  ;;  %v3106_v49 = vld [vmem:[%s3890_s5 + $0x70] sm:$0xff]   ;;  %v3107_v51 = vld [vmem:[%s3890_s5 + $0x178] sm:$0xff]  }
 0x102   : > { %2789 = vmatprep.subr.bf16.mxu0 %v3080_v59  ;;  %v609_v0 = vld [vmem:[#allocation2 + $0x2f] sm:$0xff]  ;;  %v3680_v53 = vld [vmem:[#allocation2 + $0x21] sm:$0xff] }
 0x103   : > { %v3551_v25 = vpack.c.bf16 %v609_v0, %v608_v52  ;;  %v3553_v1 = vld [vmem:[#allocation2 + $0x47] sm:$0xff]  ;;  %v3615_v23 = vld [vmem:[#allocation2 + $0x30] sm:$0xff]  ;;  %v3108_v52 = vld [vmem:[%s3890_s5 + $0x78] sm:$0xff]  }
 0x104   : > { %2766 = vmatpush3.bf16.msra.mxu1 %v3079_v50  ;;  %v610_v26 = vld [vmem:[#allocation2 + $0x37] sm:$0xff]  ;;  %v611_v3 = vld [vmem:[#allocation2 + $0x3f] sm:$0xff]  ;;  %v887_v32 = vld [vmem:[#allocation2 + $0x4f] sm:$0xff]  ;;  %v1087_v50 = vpack.c.bf16 %v3606_v18, %v3557_v4 }
 0x105   : > { %2790 = vmatpush3.bf16.msra.mxu0 %v3080_v59  ;;  %2767 = vmatprep.subr.bf16.mxu1 %v3081_v62  ;;  %v3562_v6 = vpack.c.bf16 %v611_v3, %v610_v26  ;;  %v635_v7 = vpack.c.bf16 %v610_v26, %v609_v0  ;;  %v636_v8 = vpack.c.bf16 %v3553_v1, %v611_v3  ;;  %v3617_v24 = vld [vmem:[#allocation2 + $0x38] sm:$0xff]  ;;  %v3633_v34 = vld [vmem:[#allocation2 + $0x48] sm:$0xff]  ;;  %v3109_v55 = vld [vmem:[%s3890_s5 + $0x80] sm:$0xff]  }
 0x106   : > { %2791 = vmatprep.subr.bf16.mxu0 %v3082_v63  ;;  %2759 = vmatprep.mubr.bf16.mxu1 %v3551_v25  ;;  %v1110_v31 = vpack.c.bf16 %v3617_v24, %v3615_v23  ;;  %v891_v36 = vpack.c.bf16 %v887_v32, %v3553_v1  ;;  %v1111_v40 = vpack.c.bf16 %v3633_v34, %v3631_v28  ;;  %v3682_v54 = vld [vmem:[#allocation2 + $0x29] sm:$0xff]  ;;  %v3694_v59 = vld [vmem:[#allocation2 + $0x31] sm:$0xff]  ;;  %v3696_v60 = vld [vmem:[#allocation2 + $0x39] sm:$0xff] }
 0x107   : > { %2760 = vmatmul.mubr.bf16.gmra.mrb[4].mxu1 %v3562_v6  ;;  %2735 = vmatprep.mubr.bf16.mxu0 %v635_v7  ;;  %v1544_v57 = vpack.c.bf16 %v3682_v54, %v3680_v53  ;;  %v1545_v0 = vpack.c.bf16 %v3696_v60, %v3694_v59  ;;  %v3712_v1 = vld [vmem:[#allocation2 + $0x49] sm:$0xff]  ;;  %v1366_v32 = vpack.c.bf16 %v3237_v21, %v3633_v34 }
 0x108   : > { %2768 = vmatpush3.bf16.msra.mxu1 %v3081_v62  ;;  %2736 = vmatmul.mubr.bf16.gmra.mrb[12].mxu0 %v636_v8  ;;  %v3112_v62 = vld [vmem:[%s3890_s5 + $0x1c8] sm:$0xff]   ;;  %v3113_v26 = vld [vmem:[%s3890_s5 + $0x90] sm:$0xff]   ;;  %v3115_v8 = vld [vmem:[%s3890_s5 + $0x98] sm:$0xff]  }
 0x109   : > { %2792 = vmatpush3.bf16.msra.mxu0 %v3082_v63  ;;  %2769 = vmatprep.subr.bf16.mxu1 %v3083_v5  ;;  %v3706_v63 = vpack.c.bf16 %v3615_v23, %v3608_v19  ;;  %v3114_v3 = vld [vmem:[%s3890_s5 + $0x1d0] sm:$0xff]   ;;  %v3130_v21 = vld [vmem:[%s3890_s5 + $0x228] sm:$0xff]  }
 0x10a   : > { %2793 = vmatprep.subr.bf16.mxu0 %v3084_v9  ;;  %2779 = vmatprep.mubr.bf16.mxu1 %v613_v56  ;;  %v3110_v56 = vld [vmem:[%s3890_s5 + $0x1c0] sm:$0xff]   ;;  %v1513_v7 = vld [vmem:[#allocation2 + $0x9] sm:$0xff] }
 0x10b   : > { %2803 = vmatprep.mubr.bf16.mxu0 %v1108_v10  ;;  %v1521_v10 = vpack.c.bf16 %v3640_v37, %v1513_v7  ;;  %v3132_v37 = vld [vmem:[%s3890_s5 + $0x238] sm:$0xff]  }
 0x10c   : > { %2770 = vmatpush3.bf16.msra.mxu1 %v3083_v5 }
 0x10d   : > { %2794 = vmatpush3.bf16.msra.mxu0 %v3084_v9  ;;  %2771 = vmatprep.subr.bf16.mxu1 %v3085_v11  ;;  %v3116_v9 = vld [vmem:[%s3890_s5 + $0x1d8] sm:$0xff]  }
 0x10e   : > { %2795 = vmatprep.subr.bf16.mxu0 %v3086_v12 }
 0x110   : > { %2772 = vmatpush3.bf16.msra.mxu1 %v3085_v11  ;;  %v3117_v11 = vld [vmem:[%s3890_s5 + $0xa0] sm:$0xff]  }
 0x111   : > { %2796 = vmatpush3.bf16.msra.mxu0 %v3086_v12  ;;  %2773 = vmatprep.subr.bf16.mxu1 %v3087_v13  ;;  %v3118_v12 = vld [vmem:[%s3890_s5 + $0x1e0] sm:$0xff]  }
 0x112   : > { %2797 = vmatprep.subr.bf16.mxu0 %v3088_v14 }
 0x114   : > { %2774 = vmatpush3.bf16.msra.mxu1 %v3087_v13  ;;  %v3119_v13 = vld [vmem:[%s3890_s5 + $0xa8] sm:$0xff]  }
 0x115   : > { %2798 = vmatpush3.bf16.msra.mxu0 %v3088_v14  ;;  %2775 = vmatprep.subr.bf16.mxu1 %v3089_v15  ;;  %v3120_v14 = vld [vmem:[%s3890_s5 + $0x1e8] sm:$0xff]  }
 0x116   : > { %2799 = vmatprep.subr.bf16.mxu0 %v3090_v16 }
 0x118   : > { %2776 = vmatpush3.bf16.msra.mxu1 %v3089_v15  ;;  %v3121_v15 = vld [vmem:[%s3890_s5 + $0xb0] sm:$0xff]  }
 0x119   : > { %2800 = vmatpush3.bf16.msra.mxu0 %v3090_v16  ;;  %2777 = vmatprep.subr.bf16.mxu1 %v3091_v39  ;;  %v3122_v16 = vld [vmem:[%s3890_s5 + $0x1f0] sm:$0xff]  }
 0x11a   : > { %2801 = vmatprep.subr.bf16.mxu0 %v3092_v58 }
 0x11c   : > { %2778 = vmatpush3.bf16.msra.mxu1 %v3091_v39  ;;  %v3123_v39 = vld [vmem:[%s3890_s5 + $0xb8] sm:$0xff]  }
 0x11d   : > { %2802 = vmatpush3.bf16.msra.mxu0 %v3092_v58  ;;  %2859 = vmatprep.subr.bf16.mxu1 %v3093_v17  ;;  %v3124_v58 = vld [vmem:[%s3890_s5 + $0x1f8] sm:$0xff]  }
 0x11e   : > { %2811 = vmatprep.subr.bf16.mxu0 %v3094_v20 }
 0x11f   : > { %2780 = vmatmul.mubr.bf16.vlgmr.msra.gmra.mrb[0].mxu1 %v3551_v25  ;;  %v3710_v25 = vld [vmem:[#allocation2 + $0x41] sm:$0xff] }
 0x120   : > { %2860 = vmatpush3.bf16.msra.mxu1 %v3093_v17  ;;  %2804 = vmatmul.mubr.bf16.vlgmr.msra.gmra.mrb[16].mxu0 %v1109_v22  ;;  %v1546_v5 = vpack.c.bf16 %v3712_v1, %v3710_v25  ;;  %v3125_v17 = vld [vmem:[%s3890_s5 + $0x200] sm:$0xff]   ;;  %v3126_v22 = vld [vmem:[%s3890_s5 + $0x208] sm:$0xff]  }
 0x121   : > { %2812 = vmatpush3.bf16.msra.mxu0 %v3094_v20  ;;  %2861 = vmatprep.subr.bf16.mxu1 %v3095_v29  ;;  %v1522_v20 = vpack.c.bf16 %v3680_v53, %v3642_v38  ;;  %v1797_v38 = vld [vmem:[#allocation2 + $0x51] sm:$0xff] }
 0x122   : > { %2813 = vmatprep.subr.bf16.mxu0 %v3096_v30  ;;  %2783 = vmatprep.mubr.bf16.mxu1 %v3562_v6  ;;  %v1089_v6 = vpack.c.bf16 %v3631_v28, %v3617_v24 }
 0x123   : > { %2807 = vmatprep.mubr.bf16.mxu0 %v1110_v31  ;;  %v1524_v31 = vpack.c.bf16 %v3710_v25, %v3696_v60 }
 0x124   : > { %2862 = vmatpush3.bf16.msra.mxu1 %v3095_v29  ;;  %v1523_v29 = vpack.c.bf16 %v3694_v59, %v3682_v54 }
 0x125   : > { %2814 = vmatpush3.bf16.msra.mxu0 %v3096_v30  ;;  %2863 = vmatprep.subr.bf16.mxu1 %v3097_v33  ;;  %v3127_v30 = vld [vmem:[%s3890_s5 + $0x210] sm:$0xff]  }
 0x126   : > { %2815 = vmatprep.subr.bf16.mxu0 %v3098_v35 }
 0x127   : > { %2784 = vmatmul.mubr.bf16.gmra.mrb[4].mxu1 %v891_v36  ;;  %v3131_v36 = vld [vmem:[%s3890_s5 + $0x230] sm:$0xff]  }
 0x128   : > { %2864 = vmatpush3.bf16.msra.mxu1 %v3097_v33  ;;  %2808 = vmatmul.mubr.bf16.gmra.mrb[20].mxu0 %v1111_v40  ;;  %v3128_v33 = vld [vmem:[%s3890_s5 + $0x218] sm:$0xff]   ;;  %v1801_v40 = vpack.c.bf16 %v1797_v38, %v3712_v1 }
 0x129   : > { %2816 = vmatpush3.bf16.msra.mxu0 %v3098_v35  ;;  %2865 = vmatprep.subr.bf16.mxu1 %v3099_v41  ;;  %v3129_v35 = vld [vmem:[%s3890_s5 + $0x220] sm:$0xff]  }
 0x12a   : > { %2817 = vmatprep.subr.bf16.mxu0 %v3100_v42  ;;  %2875 = vmatprep.mubr.bf16.mxu1 %v1543_v43  ;;  %v3135_v43 = vld [vmem:[%s3893_s8 + $0x10] sm:$0xff]  }
 0x12b   : > { %2827 = vmatprep.mubr.bf16.mxu0 %v1086_v44  ;;  %v3136_v44 = vld [vmem:[%s3893_s8 + $0x18] sm:$0xff]  }
 0x12c   : > { %2866 = vmatpush3.bf16.msra.mxu1 %v3099_v41  ;;  %v3133_v41 = vld [vmem:[%s3893_s8] sm:$0xff]  }
 0x12d   : > { %2818 = vmatpush3.bf16.msra.mxu0 %v3100_v42  ;;  %2867 = vmatprep.subr.bf16.mxu1 %v3101_v45  ;;  %v3134_v42 = vld [vmem:[%s3893_s8 + $0x8] sm:$0xff]  }
 0x12e   : > { %2819 = vmatprep.subr.bf16.mxu0 %v3102_v27 }
 0x130   : > { %2868 = vmatpush3.bf16.msra.mxu1 %v3101_v45  ;;  %v3137_v45 = vld [vmem:[%s3893_s8 + $0x20] sm:$0xff]  }
 0x131   : > { %2820 = vmatpush3.bf16.msra.mxu0 %v3102_v27  ;;  %2869 = vmatprep.subr.bf16.mxu1 %v3103_v46 }
 0x132   : > { %2821 = vmatprep.subr.bf16.mxu0 %v3104_v47 }
 0x134   : > { %2870 = vmatpush3.bf16.msra.mxu1 %v3103_v46 }
 0x135   : > { %2822 = vmatpush3.bf16.msra.mxu0 %v3104_v47  ;;  %2871 = vmatprep.subr.bf16.mxu1 %v3105_v48 }
 0x136   : > { %2823 = vmatprep.subr.bf16.mxu0 %v3106_v49 }
 0x138   : > { %2872 = vmatpush3.bf16.msra.mxu1 %v3105_v48  ;;  %v3138_v48 = vld [vmem:[%s3893_s8 + $0x28] sm:$0xff]  }
 0x139   : > { %2824 = vmatpush3.bf16.msra.mxu0 %v3106_v49  ;;  %2873 = vmatprep.subr.bf16.mxu1 %v3107_v51 }
 0x13a   : > { %2825 = vmatprep.subr.bf16.mxu0 %v3108_v52 }
 0x13c   : > { %2874 = vmatpush3.bf16.msra.mxu1 %v3107_v51  ;;  %v3139_v51 = vld [vmem:[%s3893_s8 + $0x30] sm:$0xff]  }
 0x13d   : > { %2826 = vmatpush3.bf16.msra.mxu0 %v3108_v52  ;;  %2883 = vmatprep.subr.bf16.mxu1 %v3109_v55 }
 0x13e   : > { %2835 = vmatprep.subr.bf16.mxu0 %v3110_v56 }
 0x13f   : > { %2876 = vmatmul.mubr.bf16.vlgmr.msra.gmra.mrb[8].mxu1 %v1544_v57 }
 0x140   : > { %2884 = vmatpush3.bf16.msra.mxu1 %v3109_v55  ;;  %2828 = vmatmul.mubr.bf16.vlgmr.msra.gmra.mrb[16].mxu0 %v1087_v50  ;;  %v3140_v55 = vld [vmem:[%s3893_s8 + $0x38] sm:$0xff]  }
 0x141   : > { %2836 = vmatpush3.bf16.msra.mxu0 %v3110_v56  ;;  %2885 = vmatprep.subr.bf16.mxu1 %v3111_v61 }
 0x142   : > { %2837 = vmatprep.subr.bf16.mxu0 %v3112_v62  ;;  %2831 = vmatprep.mubr.bf16.mxu0 %v3706_v63 }
 0x143   : > { %2879 = vmatprep.mubr.bf16.mxu1 %v1545_v0 }
 0x144   : > { %2886 = vmatpush3.bf16.msra.mxu1 %v3111_v61 }
 0x145   : > { %2838 = vmatpush3.bf16.msra.mxu0 %v3112_v62  ;;  %2887 = vmatprep.subr.bf16.mxu1 %v3113_v26 }
 0x146   : > { %2839 = vmatprep.subr.bf16.mxu0 %v3114_v3 }
 0x147   : > { %2880 = vmatmul.mubr.bf16.gmra.mrb[12].mxu1 %v1546_v5 }
 0x148   : > { %2888 = vmatpush3.bf16.msra.mxu1 %v3113_v26  ;;  %2832 = vmatmul.mubr.bf16.gmra.mrb[20].mxu0 %v1089_v6 }
 0x149   : > { %2840 = vmatpush3.bf16.msra.mxu0 %v3114_v3  ;;  %2889 = vmatprep.subr.bf16.mxu1 %v3115_v8 }
 0x14a   : > { %2841 = vmatprep.subr.bf16.mxu0 %v3116_v9  ;;  %2851 = vmatprep.mubr.bf16.mxu0 %v1087_v50 }
 0x14b   : > { %2899 = vmatprep.mubr.bf16.mxu1 %v1521_v10 }
 0x14c   : > { %2890 = vmatpush3.bf16.msra.mxu1 %v3115_v8 }
 0x14d   : > { %2842 = vmatpush3.bf16.msra.mxu0 %v3116_v9  ;;  %2891 = vmatprep.subr.bf16.mxu1 %v3117_v11  ;;  %v1043_v9 = vpop.permute.xlu1 %1042 }
 0x14e   : > { %2843 = vmatprep.subr.bf16.mxu0 %v3118_v12 }
 0x150   : > { %2892 = vmatpush3.bf16.msra.mxu1 %v3117_v11 }
 0x151   : > { %2844 = vmatpush3.bf16.msra.mxu0 %v3118_v12  ;;  %2893 = vmatprep.subr.bf16.mxu1 %v3119_v13  ;;  %v1048_v10 = vpop.permute.xlu1 %1047 }
 0x152   : > { %2845 = vmatprep.subr.bf16.mxu0 %v3120_v14 }
 0x154   : > { %2894 = vmatpush3.bf16.msra.mxu1 %v3119_v13  ;;  %v1033_v13 = vpop.permute.xlu0 %1032 }
 0x155   : > { %2846 = vmatpush3.bf16.msra.mxu0 %v3120_v14  ;;  %2895 = vmatprep.subr.bf16.mxu1 %v3121_v15  ;;  %v1946_v11 = vpop.permute.xlu1 %1945 }
 0x156   : > { %2847 = vmatprep.subr.bf16.mxu0 %v3122_v16 }
 0x158   : > { %2896 = vmatpush3.bf16.msra.mxu1 %v3121_v15  ;;  %v1038_v15 = vpop.permute.xlu0 %1037 }
 0x159   : > { %2848 = vmatpush3.bf16.msra.mxu0 %v3122_v16  ;;  %2897 = vmatprep.subr.bf16.mxu1 %v3123_v39  ;;  %v1950_v12 = vpop.permute.xlu1 %1949 }
 0x15a   : > { %2849 = vmatprep.subr.bf16.mxu0 %v3124_v58 }
 0x15c   : > { %2898 = vmatpush3.bf16.msra.mxu1 %v3123_v39 }
 0x15d   : > { %2850 = vmatpush3.bf16.msra.mxu0 %v3124_v58  ;;  %2907 = vmatprep.subr.bf16.mxu1 %v3125_v17  ;;  %v1053_v14 = vpop.permute.xlu1 %1052 }
 0x15e   : > { %2931 = vmatprep.subr.bf16.mxu0 %v3133_v41 }
 0x15f   : > { %2900 = vmatmul.mubr.bf16.vlgmr.msra.gmra.mrb[8].mxu1 %v1522_v20 }
 0x160   : > { %2852 = vmatmul.mubr.bf16.vlgmr.msra.gmra.mrb[16].mxu0 %v3706_v63  ;;  %2908 = vmatpush3.bf16.msra.mxu1 %v3125_v17 }
 0x161   : > { %2909 = vmatprep.subr.bf16.mxu1 %v3126_v22  ;;  %2855 = vmatprep.mubr.bf16.mxu0 %v1089_v6  ;;  %v1063_v39 = vpop.permute.xlu1 %1062 }
 0x162   : > { %2903 = vmatprep.mubr.bf16.mxu1 %v1523_v29  ;;  %2932 = vmatpush3.bf16.msra.mxu0 %v3133_v41 }
 0x163   : > { %2933 = vmatprep.subr.bf16.mxu0 %v3134_v42 }
 0x164   : > { %2910 = vmatpush3.bf16.msra.mxu1 %v3126_v22 }
 0x165   : > { %2911 = vmatprep.subr.bf16.mxu1 %v3127_v30 }
 0x166   : > { %2934 = vmatpush3.bf16.msra.mxu0 %v3134_v42 }
 0x167   : > { %2904 = vmatmul.mubr.bf16.gmra.mrb[12].mxu1 %v1524_v31  ;;  %2935 = vmatprep.subr.bf16.mxu0 %v3135_v43 }
 0x168   : > { %2856 = vmatmul.mubr.bf16.gmra.mrb[20].mxu0 %v1366_v32  ;;  %2912 = vmatpush3.bf16.msra.mxu1 %v3127_v30 }
 0x169   : > { %2913 = vmatprep.subr.bf16.mxu1 %v3128_v33  ;;  %2923 = vmatprep.mubr.bf16.mxu1 %v1522_v20 }
 0x16a   : > { %2936 = vmatpush3.bf16.msra.mxu0 %v3135_v43 }
 0x16b   : > { %2937 = vmatprep.subr.bf16.mxu0 %v3136_v44 }
 0x16c   : > { %2914 = vmatpush3.bf16.msra.mxu1 %v3128_v33 }
 0x16d   : > { %2915 = vmatprep.subr.bf16.mxu1 %v3129_v35 }
 0x16e   : > { %2938 = vmatpush3.bf16.msra.mxu0 %v3136_v44 }
 0x16f   : > { %2939 = vmatprep.subr.bf16.mxu0 %v3137_v45 }
 0x170   : > { %2916 = vmatpush3.bf16.msra.mxu1 %v3129_v35 }
 0x171   : > { %2917 = vmatprep.subr.bf16.mxu1 %v3130_v21 }
 0x172   : > { %2940 = vmatpush3.bf16.msra.mxu0 %v3137_v45 }
 0x173   : > { %2941 = vmatprep.subr.bf16.mxu0 %v3138_v48 }
 0x174   : > { %2918 = vmatpush3.bf16.msra.mxu1 %v3130_v21 }
 0x175   : > { %2919 = vmatprep.subr.bf16.mxu1 %v3131_v36 }
 0x176   : > { %2942 = vmatpush3.bf16.msra.mxu0 %v3138_v48 }
 0x177   : > { %2943 = vmatprep.subr.bf16.mxu0 %v3139_v51 }
 0x178   : > { %2920 = vmatpush3.bf16.msra.mxu1 %v3131_v36  ;;  %v1068_v36 = vpop.permute.xlu1 %1067 }
 0x179   : > { %2921 = vmatprep.subr.bf16.mxu1 %v3132_v37 }
 0x17a   : > { %2944 = vmatpush3.bf16.msra.mxu0 %v3139_v51 }
 0x17b   : > { %2945 = vmatprep.subr.bf16.mxu0 %v3140_v55 }
 0x17c   : > { %2922 = vmatpush3.bf16.msra.mxu1 %v3132_v37  ;;  %v1058_v37 = vpop.permute.xlu0 %1057 }
 0x17e   : > { %2946 = vmatpush3.bf16.msra.mxu0 %v3140_v55 }
 0x17f   : > { %2924 = vmatmul.mubr.bf16.vlgmr.msra.gmra.mrb[8].mxu1 %v1523_v29 }
 0x180   : > { %2927 = vmatprep.mubr.bf16.mxu1 %v1524_v31  ;;  %v1942_v51 = vpop.permute.xlu0 %1941 }
 0x187   : > { %2928 = vmatmul.mubr.bf16.gmra.mrb[12].mxu1 %v1801_v40 }
 0x1d3   : > { %v2733_v27 = vpop.f32.mrb[8].mxu0 }
 0x1d4   : > { %v736_v46 = vpop.f32.mrb[9].mxu0 }
 0x1d5   : > { %v2734_v47 = vpop.f32.mrb[10].mxu0 }
 0x1d6   : > { %v739_v49 = vpop.f32.mrb[11].mxu0 }
 0x1db   : > { %v2737_v52 = vpop.f32.mrb[12].mxu0 }
 0x1dc   : > { %v752_v53 = vpop.f32.mrb[13].mxu0 }
 0x1dd   : > { %v2738_v54 = vpop.f32.mrb[14].mxu0 }
 0x1de   : > { %v755_v56 = vpop.f32.mrb[15].mxu0 }
 0x1f2   : > { %v2781_v57 = vpop.f32.mrb[0].mxu1 }
 0x1f3   : > { %v2955_v50 = vadd.f32 %v2781_v57, %v2733_v27  ;;  %v991_v59 = vpop.f32.mrb[1].mxu1  ;;  %v2555_v57 = vld [vmem:[%s3891_s6] ss:$0 sm:$0xff] }
 0x1f4   : > { %v2956_v60 = vadd.f32 %v991_v59, %v736_v46  ;;  %v2782_v61 = vpop.f32.mrb[2].mxu1 }
 0x1f5   : > { %v2957_v62 = vadd.f32 %v2782_v61, %v2734_v47  ;;  %v994_v63 = vpop.f32.mrb[3].mxu1  ;;  %v1072_v16 = vmul.f32 %v2955_v50, %v1043_v9 }
 0x1f6   : > { %v2958_v0 = vadd.f32 %v994_v63, %v739_v49  ;;  %v1070_v17 = vmul.f32 %v2956_v60, %v1033_v13 }
 0x1f7   : > { %v1073_v29 = vmul.f32 %v2957_v62, %v1048_v10 }
 0x1f8   : > { %v1071_v30 = vmul.f32 %v2958_v0, %v1038_v15  ;;  %v2556_v0 = vld [vmem:[%s3892_s7] ss:$0 sm:$0xff] }
 0x1fa   : > { %v2785_v25 = vpop.f32.mrb[4].mxu1 }
 0x1fb   : > { %v2959_v1 = vadd.f32 %v2785_v25, %v2737_v52  ;;  %v1007_v26 = vpop.f32.mrb[5].mxu1  ;;  %v1954_v52 = vpop.permute.xlu0 %1953 }
 0x1fc   : > { %v2960_v3 = vadd.f32 %v1007_v26, %v752_v53  ;;  %v2786_v5 = vpop.f32.mrb[6].mxu1 }
 0x1fd   : > { %v2961_v6 = vadd.f32 %v2786_v5, %v2738_v54  ;;  %v1010_v7 = vpop.f32.mrb[7].mxu1  ;;  %v1076_v38 = vmul.f32 %v2959_v1, %v1063_v39  ;;  %v1962_v54 = vpop.permute.xlu1 %1961 }
 0x1fe   : > { %v2962_v8 = vadd.f32 %v1010_v7, %v755_v56  ;;  %v1074_v41 = vmul.f32 %v2960_v3, %v1053_v14 }
 0x1ff   : > { %v1077_v42 = vmul.f32 %v2961_v6, %v1068_v36  ;;  %v1958_v63 = vpop.permute.xlu0 %1957 }
 0x200   : > { %v1075_v45 = vmul.f32 %v2962_v8, %v1058_v37 }
 0x201   : > { %v1966_v7 = vpop.permute.xlu1 %1965 }
 0x203   : > { %v1970_v39 = vpop.permute.xlu0 %1969 }
 0x233   : > { %v2853_v58 = vpop.f32.mrb[16].mxu0 }
 0x234   : > { %v1507_v20 = vadd.f32 %v2853_v58, %v1072_v16  ;;  %v1466_v22 = vpop.f32.mrb[17].mxu0 }
 0x235   : > { %v1505_v31 = vadd.f32 %v1466_v22, %v1070_v17  ;;  %v2854_v32 = vpop.f32.mrb[18].mxu0 }
 0x236   : > { %v1508_v33 = vadd.f32 %v2854_v32, %v1073_v29  ;;  %v1469_v35 = vpop.f32.mrb[19].mxu0 }
 0x237   : > { %v1506_v21 = vadd.f32 %v1469_v35, %v1071_v30 }
 0x23b   : > { %v2857_v40 = vpop.f32.mrb[20].mxu0 }
 0x23c   : > { %v1511_v43 = vadd.f32 %v2857_v40, %v1076_v38  ;;  %v1482_v44 = vpop.f32.mrb[21].mxu0 }
 0x23d   : > { %v1509_v27 = vadd.f32 %v1482_v44, %v1074_v41  ;;  %v2858_v46 = vpop.f32.mrb[22].mxu0 }
 0x23e   : > { %v1512_v47 = vadd.f32 %v2858_v46, %v1077_v42  ;;  %v1485_v48 = vpop.f32.mrb[23].mxu0 }
 0x23f   : > { %v1510_v49 = vadd.f32 %v1485_v48, %v1075_v45 }
 0x252   : > { %v2925_v53 = vpop.f32.mrb[8].mxu1 }
 0x253   : > { %v1974_v55 = vmul.f32 %v2925_v53, %v1950_v12  ;;  %v1901_v56 = vpop.f32.mrb[9].mxu1 }
 0x254   : > { %v1972_v50 = vmul.f32 %v1942_v51, %v1901_v56  ;;  %v2926_v59 = vpop.f32.mrb[10].mxu1 }
 0x255   : > { %v1982_v60 = vadd.f32 %v1974_v55, %v1507_v20  ;;  %v1975_v61 = vmul.f32 %v2926_v59, %v1954_v52  ;;  %v1904_v62 = vpop.f32.mrb[11].mxu1 }
 0x256   : > { %v1980_v25 = vadd.f32 %v1972_v50, %v1505_v31  ;;  %v1973_v1 = vmul.f32 %v1946_v11, %v1904_v62 }
 0x257   : > { %v1997_v26 = vmul.f32 %v2555_v57, %v1982_v60  ;;  %v1983_v3 = vadd.f32 %v1975_v61, %v1508_v33 }
 0x258   : > { %v1995_v5 = vmul.f32 %v2555_v57, %v1980_v25  ;;  %v1981_v6 = vadd.f32 %v1973_v1, %v1506_v21 }
 0x259   : > { %v2012_v8 = vadd.f32 %v2556_v0, %v1997_v26  ;;  %v1998_v9 = vmul.f32 %v2555_v57, %v1983_v3 }
 0x25a   : > { %v1996_v10 = vmul.f32 %v2555_v57, %v1981_v6  ;;  %v2929_v12 = vpop.f32.mrb[12].mxu1  ;;  %v2010_v13 = vadd.f32 %v2556_v0, %v1995_v5 }
 0x25b   : > { %v2013_v14 = vadd.f32 %v2556_v0, %v1998_v9  ;;  %v1978_v15 = vmul.f32 %v2929_v12, %v1966_v7  ;;  %v1917_v16 = vpop.f32.mrb[13].mxu1  ;;  %v2020_v22 = vmax.f32 %v2012_v8, 0.0 }
 0x25c   : > { %v1976_v58 = vmul.f32 %v1958_v63, %v1917_v16  ;;  %v2930_v17 = vpop.f32.mrb[14].mxu1  ;;  %v2011_v20 = vadd.f32 %v2556_v0, %v1996_v10  ;;  %v2018_v35 = vmax.f32 %v2010_v13, 0.0 }
 0x25d   : > { %v2021_v29 = vmax.f32 %v2013_v14, 0.0  ;;  %v1986_v11 = vadd.f32 %v1978_v15, %v1511_v43  ;;  %v1979_v30 = vmul.f32 %v2930_v17, %v1970_v39  ;;  %v1920_v31 = vpop.f32.mrb[15].mxu1 }
 0x25e   : > { %v1984_v32 = vadd.f32 %v1976_v58, %v1509_v27  ;;  %v1977_v33 = vmul.f32 %v1962_v54, %v1920_v31  ;;  %v2019_v21 = vmax.f32 %v2011_v20, 0.0 }
 0x25f   : > { %v2027_v36 = vpack.c.bf16 %v2021_v29, %v2020_v22  ;;  %v2001_v37 = vmul.f32 %v2555_v57, %v1986_v11  ;;  %v1987_v38 = vadd.f32 %v1979_v30, %v1512_v47  ;;  %v2557_v47 = vld [vmem:[%s3894_s9] ss:$0 sm:$0xff] }
 0x260   : > { %v1999_v40 = vmul.f32 %v2555_v57, %v1984_v32  ;;  %v1985_v41 = vadd.f32 %v1977_v33, %v1510_v49  ;;  %v2026_v42 = vpack.c.bf16 %v2019_v21, %v2018_v35 }
 0x261   : > { %v2002_v44 = vmul.f32 %v2555_v57, %v1987_v38  ;;  %v2016_v45 = vadd.f32 %v2556_v0, %v2001_v37 }
 0x262   : > { %v2000_v46 = vmul.f32 %v2555_v57, %v1985_v41  ;;  %2947 = vmatprep.mubr.bf16.mxu0 %v2026_v42  ;;  %v2014_v48 = vadd.f32 %v2556_v0, %v1999_v40 }
 0x263   : > { %2948 = vmatmul.mubr.bf16.vlgmr.msra.gmra.mrb[24].mxu0 %v2027_v36  ;;  %v2017_v51 = vadd.f32 %v2556_v0, %v2002_v44  ;;  %v2024_v52 = vmax.f32 %v2016_v45, 0.0 }
 0x264   : > { %v2015_v43 = vadd.f32 %v2556_v0, %v2000_v46  ;;  %v2022_v27 = vmax.f32 %v2014_v48, 0.0 }
 0x265   : > { %v2025_v53 = vmax.f32 %v2017_v51, 0.0 }
 0x266   : > { %v2023_v54 = vmax.f32 %v2015_v43, 0.0 }
 0x267   : > { %v2029_v55 = vpack.c.bf16 %v2025_v53, %v2024_v52 }
 0x268   : > { %v2028_v56 = vpack.c.bf16 %v2023_v54, %v2022_v27 }
 0x26a   : > { %2951 = vmatprep.mubr.bf16.mxu0 %v2028_v56 }
 0x26b   : > { %2952 = vmatmul.mubr.bf16.gmra.mrb[28].mxu0 %v2029_v55 }
 0x336   : > { %v2949_v49 = vpop.f32.mrb[24].mxu0 }
 0x337   : > { %v2144_v50 = vadd.f32 %v2949_v49, %v2557_v47  ;;  %v2135_v57 = vpop.f32.mrb[25].mxu0 }
 0x338   : > { %v2136_v59 = vadd.f32 %v2557_v47, %v2135_v57  ;;  %v2950_v60 = vpop.f32.mrb[26].mxu0 }
 0x339   : > { %v2168_v61 = vsub.f32 0.0, %v2144_v50  ;;  %v2147_v62 = vadd.f32 %v2950_v60, %v2557_v47  ;;  %v2138_v63 = vpop.f32.mrb[27].mxu0 }
 0x33a   : > { %v2166_v0 = vsub.f32 0.0, %v2136_v59  ;;  %v2139_v25 = vadd.f32 %v2557_v47, %v2138_v63 }
 0x33b   : > { %v2178_v1 = vmul.f32 1.442695, %v2168_v61  ;;  %v2169_v26 = vsub.f32 0.0, %v2147_v62 }
 0x33c   : > { %v2174_v3 = vmul.f32 1.442695, %v2166_v0  ;;  %v2167_v5 = vsub.f32 0.0, %v2139_v25 }
 0x33d   : > { %3141 = vpow2.f32 %v2178_v1  ;;  %v2180_v6 = vmul.f32 1.442695, %v2169_v26 }
 0x33e   : > { %3143 = vpow2.f32 %v2174_v3  ;;  %v2176_v7 = vmul.f32 1.442695, %v2167_v5  ;;  %v2953_v8 = vpop.f32.mrb[28].mxu0 }
 0x33f   : > { %3145 = vpow2.f32 %v2180_v6  ;;  %v2160_v9 = vadd.f32 %v2953_v8, %v2557_v47  ;;  %v2151_v10 = vpop.f32.mrb[29].mxu0 }
 0x340   : > { %3147 = vpow2.f32 %v2176_v7  ;;  %v2152_v12 = vadd.f32 %v2557_v47, %v2151_v10  ;;  %v2954_v13 = vpop.f32.mrb[30].mxu0 }
 0x341   : > { %v2172_v14 = vsub.f32 0.0, %v2160_v9  ;;  %v2163_v15 = vadd.f32 %v2954_v13, %v2557_v47  ;;  %v2154_v16 = vpop.f32.mrb[31].mxu0 }
 0x342   : > { %v2170_v39 = vsub.f32 0.0, %v2152_v12  ;;  %v2155_v58 = vadd.f32 %v2557_v47, %v2154_v16 }
 0x343   : > { %v2186_v17 = vmul.f32 1.442695, %v2172_v14  ;;  %v2173_v20 = vsub.f32 0.0, %v2163_v15 }
 0x344   : > { %v2182_v22 = vmul.f32 1.442695, %v2170_v39  ;;  %v2171_v29 = vsub.f32 0.0, %v2155_v58 }
 0x345   : > { %3149 = vpow2.f32 %v2186_v17  ;;  %v2188_v11 = vmul.f32 1.442695, %v2173_v20 }
 0x346   : > { %3151 = vpow2.f32 %v2182_v22  ;;  %v2184_v30 = vmul.f32 1.442695, %v2171_v29 }
 0x347   : > { %v3142_v31 = vpop.eup %3141  ;;  %3153 = vpow2.f32 %v2188_v11 }
 0x348   : > { %v3144_v32 = vpop.eup %3143  ;;  %v2192_v33 = vadd.f32 1.0, %v3142_v31  ;;  %3155 = vpow2.f32 %v2184_v30 }
 0x349   : > { %v3146_v35 = vpop.eup %3145  ;;  %v2190_v21 = vadd.f32 1.0, %v3144_v32 }
 0x34a   : > { %v3148_v36 = vpop.eup %3147  ;;  %3157 = vrcp.f32 %v2192_v33  ;;  %v2193_v37 = vadd.f32 1.0, %v3146_v35 }
 0x34b   : > { %3159 = vrcp.f32 %v2190_v21  ;;  %v2191_v38 = vadd.f32 1.0, %v3148_v36 }
 0x34c   : > { %3161 = vrcp.f32 %v2193_v37 }
 0x34d   : > { %3163 = vrcp.f32 %v2191_v38 }
 0x34f   : > { %v3150_v40 = vpop.eup %3149 }
 0x350   : > { %v3152_v41 = vpop.eup %3151  ;;  %v2196_v42 = vadd.f32 1.0, %v3150_v40 }
 0x351   : > { %v3154_v44 = vpop.eup %3153  ;;  %v2194_v45 = vadd.f32 1.0, %v3152_v41 }
 0x352   : > { %v3156_v46 = vpop.eup %3155  ;;  %3165 = vrcp.f32 %v2196_v42  ;;  %v2197_v48 = vadd.f32 1.0, %v3154_v44 }
 0x353   : > { %3167 = vrcp.f32 %v2194_v45  ;;  %v2195_v51 = vadd.f32 1.0, %v3156_v46 }
 0x354   : > { %v3158_v43 = vpop.eup %3157  ;;  %3169 = vrcp.f32 %v2197_v48 }
 0x355   : > { %v3160_v52 = vpop.eup %3159  ;;  %v2208_v53 = vmul.f32 %v3158_v43, %v3606_v18  ;;  %3171 = vrcp.f32 %v2195_v51 }
 0x356   : > { %v3162_v27 = vpop.eup %3161  ;;  %v2206_v54 = vmul.f32 %v3160_v52, %v3555_v2 }
 0x357   : > { %v3164_v55 = vpop.eup %3163  ;;  %2216 = vst [vmem:[%s367_s26 + $0x10] sm:$0xff] %v2208_v53  ;;  %v2209_v56 = vmul.f32 %v3162_v27, %v3608_v19 }
 0x358   : > { %2214 = vst [vmem:[%s367_s26] sm:$0xff] %v2206_v54  ;;  %v2207_v47 = vmul.f32 %v3164_v55, %v3557_v4 }
 0x359   : > { %2217 = vst [vmem:[%s367_s26 + $0x18] sm:$0xff] %v2209_v56 }
 0x35a   : > { %2215 = vst [vmem:[%s367_s26 + $0x8] sm:$0xff] %v2207_v47 }
 0x35c   : > { %v3166_v49 = vpop.eup %3165 }
 0x35d   : > { %v3168_v50 = vpop.eup %3167  ;;  %v2212_v18 = vmul.f32 %v3166_v49, %v3631_v28 }
 0x35e   : > { %v3170_v57 = vpop.eup %3169  ;;  %v2210_v2 = vmul.f32 %v3168_v50, %v3615_v23 }
 0x35f   : > { %v3172_v59 = vpop.eup %3171  ;;  %2220 = vst [vmem:[%s367_s26 + $0x30] sm:$0xff] %v2212_v18  ;;  %v2213_v19 = vmul.f32 %v3170_v57, %v3633_v34 }
 0x360   : > { %2218 = vst [vmem:[%s367_s26 + $0x20] sm:$0xff] %v2210_v2  ;;  %v2211_v4 = vmul.f32 %v3172_v59, %v3617_v24 }
 0x361   : > { %2221 = vst [vmem:[%s367_s26 + $0x38] sm:$0xff] %v2213_v19 }
 0x362   : > { %2219 = vst [vmem:[%s367_s26 + $0x28] sm:$0xff] %v2211_v4 }
 0x363   : > { %3186 = shalt.err (!%p3183_p3)
}
 0x364   : > { %s3187_s30 = scalar_lea.hbm %s3837_s21, 1024  ;;  %s3191_s11 = scalar_lea.hbm %s3895_s10, 2048 }
 0x365   : > { %p3188_p4 = scmp.ne.s32.totalorder %s3837_s21, %s3187_s30  ;;  %p3192_p9 = scmp.lt.u32.totalorder %s3837_s21, %s3895_s10 }
 0x366   : > { %p3193_p10 = scmp.lt.u32.totalorder %s3191_s11, %s3187_s30  ;;  %p3195_p12 = scmp.lt.u32.totalorder %s3187_s30, %s3837_s21 }
 0x367   : > { %p3189_p7 = pnand %p3188_p4, %p3336_p5 }
 0x368   : > { %p3194_p11 = por %p3193_p10, %p3192_p9 }
 0x369   : > { %p3190_p8 = pneg %p3189_p7 }
 0x36a   : > { %p3196_p13 = por %p3195_p12, %p3194_p11 }
 0x36c   : > { %p3197_p0 = pnand %p3196_p13, %p3190_p8 }
 0x36e   : > { %3200 = shalt.err (!%p3197_p0)
}
 0x36f   : > { %s3241_s27 = smov 128   ;;  %s3242_s29 = smov 8  }
 0x370   : > { %3004 = dma.vmem_to_hbm [thread:$0]  (%p3336_p5), %s3839_s20, 1024, %s3837_s21, %s3844_s17, %s3241_s27, %s3241_s27, %s3242_s29  }
 0x371 PF: > { %p3010_p1 = scmp.ge.s32.totalorder %s3235_s16, 2  ;;  %s2251_s12 = sand.u32 1, %s3223_s13  }
 0x372   : > { %s2252_s30 = scalar_lea.sflag [#allocation4], %s2251_s12 }
 0x373   : > { %p3007_p2 = pnand %p3010_p1, %p3340_p6 }
 0x375   : > { %3218 = dma.done.wait (!%p3007_p2), %s2252_s30, 1024  }
 0x376   : > { %3220 = vsyncadd (!%p3007_p2), %s2252_s30, 4294966272  ;;  %p20_p3 = scmp.ge.s32.totalorder %s3323_s19, 4   ;;  %s3898_s13 = smov %s3227_s14 }
 0x377   : > { %s3899_s14 = smov %s3231_s15  ;;  %s3900_s15 = smov %s3334_s22 }
 0x378   : > { %s3901_s16 = smov %s3323_s19  ;;  %22 = sbr.rel (!%p20_p3) target bundleno = 3 (0x3), region = 109 }
 0x37f   :  { %2257 = vsyncpa [#allocation4], 1 }
 0x380   :  { %2259 = vsyncpa [#allocation4 + $0x1], 1 }

</bundles_post_ra>
